<compile_context>
chip_gen: v7x
topology: tpu7x:2x2x1
jax: 0.10.0
libtpu: 0.0.40
codegen_flags: <defaults>
</compile_context>

<pallas_src>
import functools

import jax
import jax.numpy as jnp
from jax import lax
from jax.experimental import pallas as pl
from jax.experimental.pallas import tpu as pltpu


# ------------------------------ in-kernel helpers ----------------------------

def _layernorm(x, g, b, eps=1e-5):
    x = x.astype(jnp.float32)
    mu = jnp.mean(x, axis=-1, keepdims=True)
    xc = x - mu
    var = jnp.mean(xc * xc, axis=-1, keepdims=True)
    return xc * lax.rsqrt(var + eps) * g + b


def _rope(z, cos, sin_next, sin_prev):
    # Interleaved rotate-half RoPE with the sign folded into zero-masked sin
    # tables built on the host:
    #   out[d] = z[d]*cos[d] + z[d+1]*sin_next[d] + z[d-1]*sin_prev[d]
    # sin_next is nonzero only at even d (= -sin), sin_prev only at odd d
    # (= +sin), so the wrap-around of the two shifts (and every head boundary)
    # is always multiplied by 0.  Tables are tiled to the full channel width,
    # so all heads are rotated in one shot.
    # TODO(synk): switch the +-1 shift to pltpu.roll once head widths are
    # lane-aligned; the concatenate form is kept for guaranteed lowering.
    z_next = jnp.concatenate([z[:, 1:], z[:, :1]], axis=1)    # z[:, d+1 (mod)]
    z_prev = jnp.concatenate([z[:, -1:], z[:, :-1]], axis=1)  # z[:, d-1 (mod)]
    return z * cos + z_next * sin_next + z_prev * sin_prev


def _erf(x):
    # Abramowitz & Stegun 7.1.26, |abs err| <= 1.5e-7.  Uses only exp / mul /
    # add / div, which all lower cleanly in Mosaic.
    a1, a2, a3, a4, a5 = 0.254829592, -0.284496736, 1.421413741, -1.453152027, 1.061405429
    p = 0.3275911
    ax = jnp.abs(x)
    t = 1.0 / (1.0 + p * ax)
    poly = ((((a5 * t + a4) * t + a3) * t + a2) * t + a1) * t
    y = 1.0 - poly * jnp.exp(-ax * ax)
    return jnp.where(x >= 0.0, y, -y)


def _gelu_exact(x):
    # torch.nn.GELU() (approximate='none'): 0.5 * x * (1 + erf(x / sqrt(2)))
    return 0.5 * x * (1.0 + _erf(x * 0.7071067811865476))


# ---------------------------------- kernel -----------------------------------

def block_kernel(x_q_ref, x_f_ref,
                 ln1g_ref, ln1b_ref,
                 wq_ref, bq_ref, wkv_ref, bkv_ref,
                 wo_ref, bo_ref,
                 ln2g_ref, ln2b_ref,
                 wfc_ref, bfc_ref, wpr_ref, bpr_ref,
                 cosq_ref, sinnq_ref, sinpq_ref,
                 cosk_ref, sinnk_ref, sinpk_ref,
                 o_ref,
                 kv_scr, y_acc,
                 *, n_head, head_dim):
    f32 = jnp.float32
    bf16 = jnp.bfloat16

    x_q = x_q_ref[0]                           # (Tq, C) query-row tile
    Tq, C = x_q.shape
    T = x_f_ref.shape[1]
    qt = pl.program_id(1)
    row0 = pl.multiple_of(qt * Tq, Tq)         # first query row of this tile

    # ----- K / V for the full sequence: computed once per batch element ------
    @pl.when(qt == 0)
    def _():
        x_f = x_f_ref[0]                                            # (T, C)
        h_f = _layernorm(x_f, ln1g_ref[...], ln1b_ref[...])         # f32
        kv = jnp.dot(h_f.astype(bf16), wkv_ref[...],
                     preferred_element_type=f32) + bkv_ref[...]     # (T, 2C)
        kv_scr[:, C:] = kv[:, C:]                                   # V
        kv_scr[:, :C] = _rope(kv[:, :C], cosk_ref[...],             # RoPE(K)
                              sinnk_ref[...], sinpk_ref[...])

    # -------------- attention branch: x + c_proj(attn(ln_1(x))) --------------
    h_q = _layernorm(x_q, ln1g_ref[...], ln1b_ref[...])             # (Tq, C)
    # 1/sqrt(head_dim) already folded into wq / bq on the host.
    q = jnp.dot(h_q.astype(bf16), wq_ref[...],
                preferred_element_type=f32) + bq_ref[...]           # (Tq, C)
    q = _rope(q, cosq_ref[...], sinnq_ref[...], sinpq_ref[...])

    k = kv_scr[:, :C]                                               # (T, C)
    v = kv_scr[:, C:]                                               # (T, C)

    rows = row0 + lax.broadcasted_iota(jnp.int32, (Tq, T), 0)
    cols = lax.broadcasted_iota(jnp.int32, (Tq, T), 1)
    causal = rows >= cols
    neg_big = f32(-1e30)

    for hi in range(n_head):                   # static unroll over heads
        lo = hi * head_dim
        qh = q[:, lo:lo + head_dim]
        kh = k[:, lo:lo + head_dim]
        vh = v[:, lo:lo + head_dim]

        s = lax.dot_general(qh.astype(bf16), kh.astype(bf16),
                            (((1,), (1,)), ((), ())),
                            preferred_element_type=f32)             # (Tq, T)
        s = jnp.where(causal, s, neg_big)
        m = jnp.max(s, axis=-1, keepdims=True)
        p = jnp.exp(s - m)
        denom = jnp.sum(p, axis=-1, keepdims=True)
        p = p * pl.reciprocal(denom, approx=True)
        # write this head's output at its static column offset (no lane concat)
        y_acc[:, lo:lo + head_dim] = jnp.dot(
            p.astype(bf16), vh.astype(bf16), preferred_element_type=f32)

    attn = jnp.dot(y_acc[...].astype(bf16), wo_ref[...],
                   preferred_element_type=f32) + bo_ref[...]
    x1 = x_q.astype(f32) + attn

    # -------------- MLP branch: x1 + c_proj(gelu(c_fc(ln_2(x1)))) ------------
    h2 = _layernorm(x1, ln2g_ref[...], ln2b_ref[...])
    fc = jnp.dot(h2.astype(bf16), wfc_ref[...],
                 preferred_element_type=f32) + bfc_ref[...]
    fc = _gelu_exact(fc)
    mlp = jnp.dot(fc.astype(bf16), wpr_ref[...],
                  preferred_element_type=f32) + bpr_ref[...]

    o_ref[0] = (x1 + mlp).astype(o_ref.dtype)


# ---------------------------------- wrapper -----------------------------------

def _rope_tables(T, head_dim, n_head):
    # NOTE: the torch reference builds inv_freq / t in bfloat16; float32 is
    # used for the table here (tiny numeric difference vs torch).
    inv_freq = 1.0 / (10000.0 ** (jnp.arange(0, head_dim, 2, dtype=jnp.float32)
                                  / head_dim))
    t = jnp.arange(T, dtype=jnp.float32)
    freqs = jnp.einsum('i,j->ij', t, inv_freq)            # (T, hd//2)
    emb = jnp.concatenate([freqs, freqs], axis=-1)        # (T, hd)
    cos = jnp.cos(emb)
    sin = jnp.sin(emb)
    even = (jnp.arange(head_dim) % 2) == 0
    sin_next = jnp.where(even, -sin, 0.0)   # coefficient of x[d+1] (even d)
    sin_prev = jnp.where(even, 0.0, sin)    # coefficient of x[d-1] (odd d)
    # Tile per-head tables across the full channel width so the whole (.., C)
    # q / k can be rotated in one shot inside the kernel.
    tile = lambda a: jnp.tile(a, (1, n_head))             # (T, C)
    return tile(cos), tile(sin_next), tile(sin_prev)


def gpt_block(x, params, n_head, q_tile=128):
    B, T, C = x.shape
    head_dim = C // n_head
    Tq = T if T <= q_tile else q_tile
    assert T % Tq == 0, "sequence length must be divisible by the query tile"
    n_qt = T // Tq
    scale = float(head_dim) ** -0.5
    bf16 = jnp.bfloat16

    # Host-side weight prep: split qkv into q / kv, fold the attention scale
    # into the q projection, cast matmul weights to bf16 (biases stay f32).
    w_q = (params['w_attn'][:, :C] * scale).astype(bf16)
    b_q = params['b_attn'][:, :C] * scale
    w_kv = params['w_attn'][:, C:].astype(bf16)
    b_kv = params['b_attn'][:, C:]
    w_o = params['w_proj'].astype(bf16)
    w_fc = params['w_fc'].astype(bf16)
    w_pr = params['w_fc2'].astype(bf16)

    cos_t, sinn_t, sinp_t = _rope_tables(T, head_dim, n_head)   # (T, C) each

    weights = [
        params['ln1_g'], params['ln1_b'],
        w_q, b_q, w_kv, b_kv,
        w_o, params['b_proj'],
        params['ln2_g'], params['ln2_b'],
        w_fc, params['b_fc'], w_pr, params['b_fc2'],
    ]

    x_q_spec = pl.BlockSpec((1, Tq, C), lambda b, t: (b, t, 0))
    x_f_spec = pl.BlockSpec((1, T, C), lambda b, t: (b, 0, 0))
    out_spec = pl.BlockSpec((1, Tq, C), lambda b, t: (b, t, 0))
    # Grid-invariant (weight) blocks: constant index_map -> fetched once.
    w_specs = [pl.BlockSpec(w.shape, lambda b, t: (0, 0)) for w in weights]
    tab_q_spec = pl.BlockSpec((Tq, C), lambda b, t: (t, 0))     # this q tile
    tab_k_spec = pl.BlockSpec((T, C), lambda b, t: (0, 0))      # full sequence

    in_specs = ([x_q_spec, x_f_spec] + w_specs
                + [tab_q_spec] * 3 + [tab_k_spec] * 3)

    # Explicit scoped-VMEM budget: weights / tables (double-buffered) +
    # activation & scratch tiles with headroom, clamped to a range that is
    # safe on v5e / v6e / v7x.
    weight_bytes = sum(int(w.size) * w.dtype.itemsize for w in weights)
    weight_bytes += 6 * int(cos_t.size) * cos_t.dtype.itemsize
    act_bytes = 4 * (4 * T * C + 16 * Tq * C + 2 * Tq * T + 2 * T * C)
    vmem_limit = int(min(64 * 2 ** 20,
                         max(32 * 2 ** 20, 2 * weight_bytes + 2 * act_bytes)))

    kernel = functools.partial(block_kernel, n_head=n_head, head_dim=head_dim)

    return pl.pallas_call(
        kernel,
        out_shape=jax.ShapeDtypeStruct((B, T, C), x.dtype),
        grid=(B, n_qt),
        in_specs=in_specs,
        out_specs=out_spec,
        scratch_shapes=[pltpu.VMEM((T, 2 * C), jnp.float32),   # RoPE(K) | V
                        pltpu.VMEM((Tq, C), jnp.float32)],     # head outputs
        compiler_params=pltpu.CompilerParams(
            dimension_semantics=("parallel", "arbitrary"),
            vmem_limit_bytes=vmem_limit),
    )(x, x, *weights, cos_t, sinn_t, sinp_t, cos_t, sinn_t, sinp_t)


# ----------------------------- pure-JAX reference ----------------------------

def ref_block(x, p, n_head):
    B, T, C = x.shape
    hd = C // n_head

    def ln(z, g, b):
        mu = z.mean(-1, keepdims=True)
        var = ((z - mu) ** 2).mean(-1, keepdims=True)
        return (z - mu) / jnp.sqrt(var + 1e-5) * g + b

    h = ln(x, p['ln1_g'], p['ln1_b'])
    qkv = h @ p['w_attn'] + p['b_attn']
    q, k, v = jnp.split(qkv, 3, axis=-1)

    def to_heads(z):
        return z.reshape(B, T, n_head, hd).transpose(0, 2, 1, 3)
    q, k, v = map(to_heads, (q, k, v))

    inv_freq = 1.0 / (10000.0 ** (jnp.arange(0, hd, 2, dtype=jnp.float32) / hd))
    t = jnp.arange(T, dtype=jnp.float32)
    freqs = jnp.einsum('i,j->ij', t, inv_freq)
    emb = jnp.concatenate([freqs, freqs], -1)
    cos = jnp.cos(emb)[None, None]
    sin = jnp.sin(emb)[None, None]

    def rot_half(z):
        z1 = z[..., ::2]
        z2 = z[..., 1::2]
        return jnp.stack([-z2, z1], axis=-1).reshape(z.shape)

    q = q * cos + rot_half(q) * sin
    k = k * cos + rot_half(k) * sin

    s = jnp.einsum('bhqd,bhkd->bhqk', q, k) / jnp.sqrt(jnp.float32(hd))
    mask = jnp.tril(jnp.ones((T, T), dtype=bool))
    s = jnp.where(mask, s, -jnp.inf)
    a = jax.nn.softmax(s, axis=-1)
    y = jnp.einsum('bhqk,bhkd->bhqd', a, v)
    y = y.transpose(0, 2, 1, 3).reshape(B, T, C)

    x1 = x + y @ p['w_proj'] + p['b_proj']
    h2 = ln(x1, p['ln2_g'], p['ln2_b'])
    fc = jax.nn.gelu(h2 @ p['w_fc'] + p['b_fc'], approximate=False)
    return x1 + fc @ p['w_fc2'] + p['b_fc2']


# ------------------------------------ main ------------------------------------

if __name__ == "__main__":
    B, T, C, n_head = 2, 8, 32, 4

    key = jax.random.PRNGKey(0)
    ks = jax.random.split(key, 9)

    def rnd(k, shape):
        return 0.02 * jax.random.normal(k, shape, dtype=jnp.float32)

    # 1-D params stored as (1, dim) so everything in the kernel is >= 2-D.
    params = {
        'ln1_g': jnp.ones((1, C), jnp.float32),
        'ln1_b': jnp.zeros((1, C), jnp.float32),
        'w_attn': rnd(ks[0], (C, 3 * C)),          # pre-transposed (in, out)
        'b_attn': rnd(ks[1], (1, 3 * C)),
        'w_proj': rnd(ks[2], (C, C)),
        'b_proj': rnd(ks[3], (1, C)),
        'ln2_g': jnp.ones((1, C), jnp.float32),
        'ln2_b': jnp.zeros((1, C), jnp.float32),
        'w_fc': rnd(ks[4], (C, 4 * C)),
        'b_fc': rnd(ks[5], (1, 4 * C)),
        'w_fc2': rnd(ks[6], (4 * C, C)),
        'b_fc2': rnd(ks[7], (1, C)),
    }

    x = jax.random.normal(ks[8], (B, T, C), dtype=jnp.float32)

    out = jax.block_until_ready(gpt_block(x, params, n_head))
    ref = ref_block(x, params, n_head)

    assert out.shape == (B, T, C)
    err = float(jnp.max(jnp.abs(out - ref)))
    # bf16 matmul operands (f32 accumulation) vs the f32 reference -> loose tol.
    assert jnp.allclose(out, ref, rtol=1e-2, atol=1e-2), f"max abs err {err}"

    # TODO(synk): the use_cache KV-cache branch and the explicit attention_mask
    # path of the PyTorch module are not exercised by the default forward and
    # are not implemented here.
    print("KERNEL_OK")
</pallas_src>

<mosaic_0001>
module attributes {stable_mosaic.version = 11 : i64} {
  func.func @block_kernel(%arg0: i32, %arg1: i32, %arg2: memref<1x8x32xf32, #tpu.memory_space<vmem>>, %arg3: memref<1x8x32xf32, #tpu.memory_space<vmem>>, %arg4: memref<1x32xf32, #tpu.memory_space<vmem>>, %arg5: memref<1x32xf32, #tpu.memory_space<vmem>>, %arg6: memref<32x32xbf16, #tpu.memory_space<vmem>>, %arg7: memref<1x32xf32, #tpu.memory_space<vmem>>, %arg8: memref<32x64xbf16, #tpu.memory_space<vmem>>, %arg9: memref<1x64xf32, #tpu.memory_space<vmem>>, %arg10: memref<32x32xbf16, #tpu.memory_space<vmem>>, %arg11: memref<1x32xf32, #tpu.memory_space<vmem>>, %arg12: memref<1x32xf32, #tpu.memory_space<vmem>>, %arg13: memref<1x32xf32, #tpu.memory_space<vmem>>, %arg14: memref<32x128xbf16, #tpu.memory_space<vmem>>, %arg15: memref<1x128xf32, #tpu.memory_space<vmem>>, %arg16: memref<128x32xbf16, #tpu.memory_space<vmem>>, %arg17: memref<1x32xf32, #tpu.memory_space<vmem>>, %arg18: memref<8x32xf32, #tpu.memory_space<vmem>>, %arg19: memref<8x32xf32, #tpu.memory_space<vmem>>, %arg20: memref<8x32xf32, #tpu.memory_space<vmem>>, %arg21: memref<8x32xf32, #tpu.memory_space<vmem>>, %arg22: memref<8x32xf32, #tpu.memory_space<vmem>>, %arg23: memref<8x32xf32, #tpu.memory_space<vmem>>, %arg24: memref<1x8x32xf32, #tpu.memory_space<vmem>>, %arg25: memref<8x64xf32, #tpu.memory_space<vmem>>, %arg26: memref<8x32xf32, #tpu.memory_space<vmem>>) attributes {dimension_semantics = [#tpu.dimension_semantics<parallel>, #tpu.dimension_semantics<arbitrary>], iteration_bounds = array<i64: 2, 1>, scalar_prefetch = 0 : i64, scratch_operands = 2 : i64, tpu.core_type = #tpu.core_type<tc>, window_params = [{transform_indices = @transform_0, window_bounds = array<i64: 1, 8, 32>}, {transform_indices = @transform_1, window_bounds = array<i64: 1, 8, 32>}, {pipeline_mode = #tpu.pipeline_mode<synchronous>, transform_indices = @transform_2, window_bounds = array<i64: 1, 32>}, {pipeline_mode = #tpu.pipeline_mode<synchronous>, transform_indices = @transform_3, window_bounds = array<i64: 1, 32>}, {pipeline_mode = #tpu.pipeline_mode<synchronous>, transform_indices = @transform_4, window_bounds = array<i64: 32, 32>}, {pipeline_mode = #tpu.pipeline_mode<synchronous>, transform_indices = @transform_5, window_bounds = array<i64: 1, 32>}, {pipeline_mode = #tpu.pipeline_mode<synchronous>, transform_indices = @transform_6, window_bounds = array<i64: 32, 64>}, {pipeline_mode = #tpu.pipeline_mode<synchronous>, transform_indices = @transform_7, window_bounds = array<i64: 1, 64>}, {pipeline_mode = #tpu.pipeline_mode<synchronous>, transform_indices = @transform_8, window_bounds = array<i64: 32, 32>}, {pipeline_mode = #tpu.pipeline_mode<synchronous>, transform_indices = @transform_9, window_bounds = array<i64: 1, 32>}, {pipeline_mode = #tpu.pipeline_mode<synchronous>, transform_indices = @transform_10, window_bounds = array<i64: 1, 32>}, {pipeline_mode = #tpu.pipeline_mode<synchronous>, transform_indices = @transform_11, window_bounds = array<i64: 1, 32>}, {pipeline_mode = #tpu.pipeline_mode<synchronous>, transform_indices = @transform_12, window_bounds = array<i64: 32, 128>}, {pipeline_mode = #tpu.pipeline_mode<synchronous>, transform_indices = @transform_13, window_bounds = array<i64: 1, 128>}, {pipeline_mode = #tpu.pipeline_mode<synchronous>, transform_indices = @transform_14, window_bounds = array<i64: 128, 32>}, {pipeline_mode = #tpu.pipeline_mode<synchronous>, transform_indices = @transform_15, window_bounds = array<i64: 1, 32>}, {transform_indices = @transform_16, window_bounds = array<i64: 8, 32>}, {transform_indices = @transform_17, window_bounds = array<i64: 8, 32>}, {transform_indices = @transform_18, window_bounds = array<i64: 8, 32>}, {pipeline_mode = #tpu.pipeline_mode<synchronous>, transform_indices = @transform_19, window_bounds = array<i64: 8, 32>}, {pipeline_mode = #tpu.pipeline_mode<synchronous>, transform_indices = @transform_20, window_bounds = array<i64: 8, 32>}, {pipeline_mode = #tpu.pipeline_mode<synchronous>, transform_indices = @transform_21, window_bounds = array<i64: 8, 32>}, {transform_indices = @transform_22, window_bounds = array<i64: 1, 8, 32>}]} {
    %c0 = arith.constant 0 : index
    %c0_0 = arith.constant 0 : index
    %c0_1 = arith.constant 0 : index
    %0 = vector.load %arg2[%c0, %c0_0, %c0_1] : memref<1x8x32xf32, #tpu.memory_space<vmem>>, vector<1x8x32xf32>
    %1 = vector.shape_cast %0 : vector<1x8x32xf32> to vector<8x32xf32>
    %c8_i32 = arith.constant 8 : i32
    %2 = arith.muli %arg1, %c8_i32 : i32
    %3 = tpu.assume_multiple %2, 8 : i32
    %c0_i32 = arith.constant 0 : i32
    %4 = arith.cmpi eq, %arg1, %c0_i32 : i32
    %5 = arith.extui %4 : i1 to i32
    %c0_i32_2 = arith.constant 0 : i32
    %6 = arith.cmpi ne, %5, %c0_i32_2 : i32
    scf.if %6 {
      %c0_94 = arith.constant 0 : index
      %c0_95 = arith.constant 0 : index
      %c0_96 = arith.constant 0 : index
      %230 = vector.load %arg3[%c0_94, %c0_95, %c0_96] : memref<1x8x32xf32, #tpu.memory_space<vmem>>, vector<1x8x32xf32>
      %231 = vector.shape_cast %230 : vector<1x8x32xf32> to vector<8x32xf32>
      %c0_97 = arith.constant 0 : index
      %c0_98 = arith.constant 0 : index
      %232 = vector.load %arg4[%c0_97, %c0_98] : memref<1x32xf32, #tpu.memory_space<vmem>>, vector<1x32xf32>
      %c0_99 = arith.constant 0 : index
      %c0_100 = arith.constant 0 : index
      %233 = vector.load %arg5[%c0_99, %c0_100] : memref<1x32xf32, #tpu.memory_space<vmem>>, vector<1x32xf32>
      %cst_101 = arith.constant dense<0.000000e+00> : vector<8xf32>
      %234 = vector.multi_reduction <add>, %231, %cst_101 [1] : vector<8x32xf32> to vector<8xf32>
      %235 = vector.shape_cast %234 : vector<8xf32> to vector<8x1xf32>
      %cst_102 = arith.constant 3.200000e+01 : f32
      %236 = vector.broadcast %cst_102 : f32 to vector<8x1xf32>
      %237 = arith.divf %235, %236 : vector<8x1xf32>
      %238 = vector.broadcast %237 : vector<8x1xf32> to vector<8x32xf32>
      %239 = arith.subf %231, %238 : vector<8x32xf32>
      %240 = arith.mulf %239, %239 : vector<8x32xf32>
      %cst_103 = arith.constant dense<0.000000e+00> : vector<8xf32>
      %241 = vector.multi_reduction <add>, %240, %cst_103 [1] : vector<8x32xf32> to vector<8xf32>
      %242 = vector.shape_cast %241 : vector<8xf32> to vector<8x1xf32>
      %cst_104 = arith.constant 3.200000e+01 : f32
      %243 = vector.broadcast %cst_104 : f32 to vector<8x1xf32>
      %244 = arith.divf %242, %243 : vector<8x1xf32>
      %cst_105 = arith.constant 9.99999974E-6 : f32
      %245 = vector.broadcast %cst_105 : f32 to vector<8x1xf32>
      %246 = arith.addf %244, %245 : vector<8x1xf32>
      %247 = math.rsqrt %246 : vector<8x1xf32>
      %248 = vector.broadcast %247 : vector<8x1xf32> to vector<8x32xf32>
      %249 = arith.mulf %239, %248 : vector<8x32xf32>
      %250 = vector.broadcast %232 : vector<1x32xf32> to vector<8x32xf32>
      %251 = arith.mulf %249, %250 : vector<8x32xf32>
      %252 = vector.broadcast %233 : vector<1x32xf32> to vector<8x32xf32>
      %253 = arith.addf %251, %252 : vector<8x32xf32>
      %254 = arith.truncf %253 : vector<8x32xf32> to vector<8x32xbf16>
      %c0_106 = arith.constant 0 : index
      %c0_107 = arith.constant 0 : index
      %255 = vector.load %arg8[%c0_106, %c0_107] : memref<32x64xbf16, #tpu.memory_space<vmem>>, vector<32x64xbf16>
      %cst_108 = arith.constant dense<0.000000e+00> : vector<8x64xf32>
      %256 = tpu.matmul %254, %255, %cst_108 {dimension_numbers = #tpu.dot_dimension_numbers<[1], [0], [0], [1], [0, 0, 1, 1], [], []>} : vector<8x32xbf16>, vector<32x64xbf16>, vector<8x64xf32> -> vector<8x64xf32>
      %c0_109 = arith.constant 0 : index
      %c0_110 = arith.constant 0 : index
      %257 = vector.load %arg9[%c0_109, %c0_110] : memref<1x64xf32, #tpu.memory_space<vmem>>, vector<1x64xf32>
      %258 = vector.broadcast %257 : vector<1x64xf32> to vector<8x64xf32>
      %259 = arith.addf %256, %258 : vector<8x64xf32>
      %260 = vector.extract_strided_slice %259 {offsets = [0, 32], sizes = [8, 32], strides = [1, 1]} : vector<8x64xf32> to vector<8x32xf32>
      %c0_111 = arith.constant 0 : index
      %c32_112 = arith.constant 32 : index
      %261 = vector.load %arg25[%c0_111, %c32_112] : memref<8x64xf32, #tpu.memory_space<vmem>>, vector<8x32xf32>
      tpu.vector_store %arg25[%c0_111, %c32_112], %260 {strides = array<i32>} : memref<8x64xf32, #tpu.memory_space<vmem>>, vector<8x32xf32>,
      %262 = vector.extract_strided_slice %259 {offsets = [0, 0], sizes = [8, 32], strides = [1, 1]} : vector<8x64xf32> to vector<8x32xf32>
      %c0_113 = arith.constant 0 : index
      %c0_114 = arith.constant 0 : index
      %263 = vector.load %arg21[%c0_113, %c0_114] : memref<8x32xf32, #tpu.memory_space<vmem>>, vector<8x32xf32>
      %c0_115 = arith.constant 0 : index
      %c0_116 = arith.constant 0 : index
      %264 = vector.load %arg22[%c0_115, %c0_116] : memref<8x32xf32, #tpu.memory_space<vmem>>, vector<8x32xf32>
      %c0_117 = arith.constant 0 : index
      %c0_118 = arith.constant 0 : index
      %265 = vector.load %arg23[%c0_117, %c0_118] : memref<8x32xf32, #tpu.memory_space<vmem>>, vector<8x32xf32>
      %266 = vector.extract_strided_slice %262 {offsets = [0, 1], sizes = [8, 31], strides = [1, 1]} : vector<8x32xf32> to vector<8x31xf32>
      %267 = vector.extract_strided_slice %262 {offsets = [0, 0], sizes = [8, 1], strides = [1, 1]} : vector<8x32xf32> to vector<8x1xf32>
      %268 = tpu.concatenate %266, %267 in 1 : vector<8x31xf32>, vector<8x1xf32> -> vector<8x32xf32>
      %269 = vector.extract_strided_slice %262 {offsets = [0, 31], sizes = [8, 1], strides = [1, 1]} : vector<8x32xf32> to vector<8x1xf32>
      %270 = vector.extract_strided_slice %262 {offsets = [0, 0], sizes = [8, 31], strides = [1, 1]} : vector<8x32xf32> to vector<8x31xf32>
      %271 = tpu.concatenate %269, %270 in 1 : vector<8x1xf32>, vector<8x31xf32> -> vector<8x32xf32>
      %272 = arith.mulf %262, %263 : vector<8x32xf32>
      %273 = arith.mulf %268, %264 : vector<8x32xf32>
      %274 = arith.addf %272, %273 : vector<8x32xf32>
      %275 = arith.mulf %271, %265 : vector<8x32xf32>
      %276 = arith.addf %274, %275 : vector<8x32xf32>
      %c0_119 = arith.constant 0 : index
      %c0_120 = arith.constant 0 : index
      %277 = vector.load %arg25[%c0_119, %c0_120] : memref<8x64xf32, #tpu.memory_space<vmem>>, vector<8x32xf32>
      tpu.vector_store %arg25[%c0_119, %c0_120], %276 {strides = array<i32>} : memref<8x64xf32, #tpu.memory_space<vmem>>, vector<8x32xf32>,
    } else {
    }
    %c0_3 = arith.constant 0 : index
    %c0_4 = arith.constant 0 : index
    %7 = vector.load %arg4[%c0_3, %c0_4] : memref<1x32xf32, #tpu.memory_space<vmem>>, vector<1x32xf32>
    %c0_5 = arith.constant 0 : index
    %c0_6 = arith.constant 0 : index
    %8 = vector.load %arg5[%c0_5, %c0_6] : memref<1x32xf32, #tpu.memory_space<vmem>>, vector<1x32xf32>
    %cst = arith.constant dense<0.000000e+00> : vector<8xf32>
    %9 = vector.multi_reduction <add>, %1, %cst [1] : vector<8x32xf32> to vector<8xf32>
    %10 = vector.shape_cast %9 : vector<8xf32> to vector<8x1xf32>
    %cst_7 = arith.constant 3.200000e+01 : f32
    %11 = vector.broadcast %cst_7 : f32 to vector<8x1xf32>
    %12 = arith.divf %10, %11 : vector<8x1xf32>
    %13 = vector.broadcast %12 : vector<8x1xf32> to vector<8x32xf32>
    %14 = arith.subf %1, %13 : vector<8x32xf32>
    %15 = arith.mulf %14, %14 : vector<8x32xf32>
    %cst_8 = arith.constant dense<0.000000e+00> : vector<8xf32>
    %16 = vector.multi_reduction <add>, %15, %cst_8 [1] : vector<8x32xf32> to vector<8xf32>
    %17 = vector.shape_cast %16 : vector<8xf32> to vector<8x1xf32>
    %cst_9 = arith.constant 3.200000e+01 : f32
    %18 = vector.broadcast %cst_9 : f32 to vector<8x1xf32>
    %19 = arith.divf %17, %18 : vector<8x1xf32>
    %cst_10 = arith.constant 9.99999974E-6 : f32
    %20 = vector.broadcast %cst_10 : f32 to vector<8x1xf32>
    %21 = arith.addf %19, %20 : vector<8x1xf32>
    %22 = math.rsqrt %21 : vector<8x1xf32>
    %23 = vector.broadcast %22 : vector<8x1xf32> to vector<8x32xf32>
    %24 = arith.mulf %14, %23 : vector<8x32xf32>
    %25 = vector.broadcast %7 : vector<1x32xf32> to vector<8x32xf32>
    %26 = arith.mulf %24, %25 : vector<8x32xf32>
    %27 = vector.broadcast %8 : vector<1x32xf32> to vector<8x32xf32>
    %28 = arith.addf %26, %27 : vector<8x32xf32>
    %29 = arith.truncf %28 : vector<8x32xf32> to vector<8x32xbf16>
    %c0_11 = arith.constant 0 : index
    %c0_12 = arith.constant 0 : index
    %30 = vector.load %arg6[%c0_11, %c0_12] : memref<32x32xbf16, #tpu.memory_space<vmem>>, vector<32x32xbf16>
    %cst_13 = arith.constant dense<0.000000e+00> : vector<8x32xf32>
    %31 = tpu.matmul %29, %30, %cst_13 {dimension_numbers = #tpu.dot_dimension_numbers<[1], [0], [0], [1], [0, 0, 1, 1], [], []>} : vector<8x32xbf16>, vector<32x32xbf16>, vector<8x32xf32> -> vector<8x32xf32>
    %c0_14 = arith.constant 0 : index
    %c0_15 = arith.constant 0 : index
    %32 = vector.load %arg7[%c0_14, %c0_15] : memref<1x32xf32, #tpu.memory_space<vmem>>, vector<1x32xf32>
    %33 = vector.broadcast %32 : vector<1x32xf32> to vector<8x32xf32>
    %34 = arith.addf %31, %33 : vector<8x32xf32>
    %c0_16 = arith.constant 0 : index
    %c0_17 = arith.constant 0 : index
    %35 = vector.load %arg18[%c0_16, %c0_17] : memref<8x32xf32, #tpu.memory_space<vmem>>, vector<8x32xf32>
    %c0_18 = arith.constant 0 : index
    %c0_19 = arith.constant 0 : index
    %36 = vector.load %arg19[%c0_18, %c0_19] : memref<8x32xf32, #tpu.memory_space<vmem>>, vector<8x32xf32>
    %c0_20 = arith.constant 0 : index
    %c0_21 = arith.constant 0 : index
    %37 = vector.load %arg20[%c0_20, %c0_21] : memref<8x32xf32, #tpu.memory_space<vmem>>, vector<8x32xf32>
    %38 = vector.extract_strided_slice %34 {offsets = [0, 1], sizes = [8, 31], strides = [1, 1]} : vector<8x32xf32> to vector<8x31xf32>
    %39 = vector.extract_strided_slice %34 {offsets = [0, 0], sizes = [8, 1], strides = [1, 1]} : vector<8x32xf32> to vector<8x1xf32>
    %40 = tpu.concatenate %38, %39 in 1 : vector<8x31xf32>, vector<8x1xf32> -> vector<8x32xf32>
    %41 = vector.extract_strided_slice %34 {offsets = [0, 31], sizes = [8, 1], strides = [1, 1]} : vector<8x32xf32> to vector<8x1xf32>
    %42 = vector.extract_strided_slice %34 {offsets = [0, 0], sizes = [8, 31], strides = [1, 1]} : vector<8x32xf32> to vector<8x31xf32>
    %43 = tpu.concatenate %41, %42 in 1 : vector<8x1xf32>, vector<8x31xf32> -> vector<8x32xf32>
    %44 = arith.mulf %34, %35 : vector<8x32xf32>
    %45 = arith.mulf %40, %36 : vector<8x32xf32>
    %46 = arith.addf %44, %45 : vector<8x32xf32>
    %47 = arith.mulf %43, %37 : vector<8x32xf32>
    %48 = arith.addf %46, %47 : vector<8x32xf32>
    %c0_22 = arith.constant 0 : index
    %c0_23 = arith.constant 0 : index
    %49 = vector.load %arg25[%c0_22, %c0_23] : memref<8x64xf32, #tpu.memory_space<vmem>>, vector<8x32xf32>
    %c0_24 = arith.constant 0 : index
    %c32 = arith.constant 32 : index
    %50 = vector.load %arg25[%c0_24, %c32] : memref<8x64xf32, #tpu.memory_space<vmem>>, vector<8x32xf32>
    %51 = tpu.iota {dimensions = array<i32: 0>} : vector<8x8xi32>
    %52 = vector.broadcast %3 : i32 to vector<8x8xi32>
    %53 = arith.addi %52, %51 : vector<8x8xi32>
    %54 = tpu.iota {dimensions = array<i32: 1>} : vector<8x8xi32>
    %55 = arith.cmpi sge, %53, %54 : vector<8x8xi32>
    %56 = vector.extract_strided_slice %48 {offsets = [0, 0], sizes = [8, 8], strides = [1, 1]} : vector<8x32xf32> to vector<8x8xf32>
    %57 = vector.extract_strided_slice %49 {offsets = [0, 0], sizes = [8, 8], strides = [1, 1]} : vector<8x32xf32> to vector<8x8xf32>
    %58 = vector.extract_strided_slice %50 {offsets = [0, 0], sizes = [8, 8], strides = [1, 1]} : vector<8x32xf32> to vector<8x8xf32>
    %59 = arith.truncf %56 : vector<8x8xf32> to vector<8x8xbf16>
    %60 = arith.truncf %57 : vector<8x8xf32> to vector<8x8xbf16>
    %cst_25 = arith.constant dense<0.000000e+00> : vector<8x8xf32>
    %61 = tpu.matmul %59, %60, %cst_25 {dimension_numbers = #tpu.dot_dimension_numbers<[1], [1], [0], [0], [0, 0, 1, 0], [], []>} : vector<8x8xbf16>, vector<8x8xbf16>, vector<8x8xf32> -> vector<8x8xf32>
    %cst_26 = arith.constant -1.000000e+30 : f32
    %62 = vector.broadcast %cst_26 : f32 to vector<8x8xf32>
    %63 = arith.select %55, %61, %62 : vector<8x8xi1>, vector<8x8xf32>
    %cst_27 = arith.constant dense<0xFF800000> : vector<8xf32>
    %64 = vector.multi_reduction <maximumf>, %63, %cst_27 [1] : vector<8x8xf32> to vector<8xf32>
    %65 = vector.shape_cast %64 : vector<8xf32> to vector<8x1xf32>
    %66 = vector.broadcast %65 : vector<8x1xf32> to vector<8x8xf32>
    %67 = arith.subf %63, %66 : vector<8x8xf32>
    %68 = math.exp %67 : vector<8x8xf32>
    %cst_28 = arith.constant dense<0.000000e+00> : vector<8xf32>
    %69 = vector.multi_reduction <add>, %68, %cst_28 [1] : vector<8x8xf32> to vector<8xf32>
    %70 = vector.shape_cast %69 : vector<8xf32> to vector<8x1xf32>
    %71 = tpu.reciprocal %70 {approx = true} : vector<8x1xf32> -> vector<8x1xf32>
    %72 = vector.broadcast %71 : vector<8x1xf32> to vector<8x8xf32>
    %73 = arith.mulf %68, %72 : vector<8x8xf32>
    %74 = arith.truncf %73 : vector<8x8xf32> to vector<8x8xbf16>
    %75 = arith.truncf %58 : vector<8x8xf32> to vector<8x8xbf16>
    %cst_29 = arith.constant dense<0.000000e+00> : vector<8x8xf32>
    %76 = tpu.matmul %74, %75, %cst_29 {dimension_numbers = #tpu.dot_dimension_numbers<[1], [0], [0], [1], [0, 0, 1, 1], [], []>} : vector<8x8xbf16>, vector<8x8xbf16>, vector<8x8xf32> -> vector<8x8xf32>
    %c0_30 = arith.constant 0 : index
    %c0_31 = arith.constant 0 : index
    %77 = vector.load %arg26[%c0_30, %c0_31] : memref<8x32xf32, #tpu.memory_space<vmem>>, vector<8x8xf32>
    tpu.vector_store %arg26[%c0_30, %c0_31], %76 {strides = array<i32>} : memref<8x32xf32, #tpu.memory_space<vmem>>, vector<8x8xf32>,
    %78 = vector.extract_strided_slice %48 {offsets = [0, 8], sizes = [8, 8], strides = [1, 1]} : vector<8x32xf32> to vector<8x8xf32>
    %79 = vector.extract_strided_slice %49 {offsets = [0, 8], sizes = [8, 8], strides = [1, 1]} : vector<8x32xf32> to vector<8x8xf32>
    %80 = vector.extract_strided_slice %50 {offsets = [0, 8], sizes = [8, 8], strides = [1, 1]} : vector<8x32xf32> to vector<8x8xf32>
    %81 = arith.truncf %78 : vector<8x8xf32> to vector<8x8xbf16>
    %82 = arith.truncf %79 : vector<8x8xf32> to vector<8x8xbf16>
    %cst_32 = arith.constant dense<0.000000e+00> : vector<8x8xf32>
    %83 = tpu.matmul %81, %82, %cst_32 {dimension_numbers = #tpu.dot_dimension_numbers<[1], [1], [0], [0], [0, 0, 1, 0], [], []>} : vector<8x8xbf16>, vector<8x8xbf16>, vector<8x8xf32> -> vector<8x8xf32>
    %cst_33 = arith.constant -1.000000e+30 : f32
    %84 = vector.broadcast %cst_33 : f32 to vector<8x8xf32>
    %85 = arith.select %55, %83, %84 : vector<8x8xi1>, vector<8x8xf32>
    %cst_34 = arith.constant dense<0xFF800000> : vector<8xf32>
    %86 = vector.multi_reduction <maximumf>, %85, %cst_34 [1] : vector<8x8xf32> to vector<8xf32>
    %87 = vector.shape_cast %86 : vector<8xf32> to vector<8x1xf32>
    %88 = vector.broadcast %87 : vector<8x1xf32> to vector<8x8xf32>
    %89 = arith.subf %85, %88 : vector<8x8xf32>
    %90 = math.exp %89 : vector<8x8xf32>
    %cst_35 = arith.constant dense<0.000000e+00> : vector<8xf32>
    %91 = vector.multi_reduction <add>, %90, %cst_35 [1] : vector<8x8xf32> to vector<8xf32>
    %92 = vector.shape_cast %91 : vector<8xf32> to vector<8x1xf32>
    %93 = tpu.reciprocal %92 {approx = true} : vector<8x1xf32> -> vector<8x1xf32>
    %94 = vector.broadcast %93 : vector<8x1xf32> to vector<8x8xf32>
    %95 = arith.mulf %90, %94 : vector<8x8xf32>
    %96 = arith.truncf %95 : vector<8x8xf32> to vector<8x8xbf16>
    %97 = arith.truncf %80 : vector<8x8xf32> to vector<8x8xbf16>
    %cst_36 = arith.constant dense<0.000000e+00> : vector<8x8xf32>
    %98 = tpu.matmul %96, %97, %cst_36 {dimension_numbers = #tpu.dot_dimension_numbers<[1], [0], [0], [1], [0, 0, 1, 1], [], []>} : vector<8x8xbf16>, vector<8x8xbf16>, vector<8x8xf32> -> vector<8x8xf32>
    %c0_37 = arith.constant 0 : index
    %c8 = arith.constant 8 : index
    %99 = vector.load %arg26[%c0_37, %c8] : memref<8x32xf32, #tpu.memory_space<vmem>>, vector<8x8xf32>
    tpu.vector_store %arg26[%c0_37, %c8], %98 {strides = array<i32>} : memref<8x32xf32, #tpu.memory_space<vmem>>, vector<8x8xf32>,
    %100 = vector.extract_strided_slice %48 {offsets = [0, 16], sizes = [8, 8], strides = [1, 1]} : vector<8x32xf32> to vector<8x8xf32>
    %101 = vector.extract_strided_slice %49 {offsets = [0, 16], sizes = [8, 8], strides = [1, 1]} : vector<8x32xf32> to vector<8x8xf32>
    %102 = vector.extract_strided_slice %50 {offsets = [0, 16], sizes = [8, 8], strides = [1, 1]} : vector<8x32xf32> to vector<8x8xf32>
    %103 = arith.truncf %100 : vector<8x8xf32> to vector<8x8xbf16>
    %104 = arith.truncf %101 : vector<8x8xf32> to vector<8x8xbf16>
    %cst_38 = arith.constant dense<0.000000e+00> : vector<8x8xf32>
    %105 = tpu.matmul %103, %104, %cst_38 {dimension_numbers = #tpu.dot_dimension_numbers<[1], [1], [0], [0], [0, 0, 1, 0], [], []>} : vector<8x8xbf16>, vector<8x8xbf16>, vector<8x8xf32> -> vector<8x8xf32>
    %cst_39 = arith.constant -1.000000e+30 : f32
    %106 = vector.broadcast %cst_39 : f32 to vector<8x8xf32>
    %107 = arith.select %55, %105, %106 : vector<8x8xi1>, vector<8x8xf32>
    %cst_40 = arith.constant dense<0xFF800000> : vector<8xf32>
    %108 = vector.multi_reduction <maximumf>, %107, %cst_40 [1] : vector<8x8xf32> to vector<8xf32>
    %109 = vector.shape_cast %108 : vector<8xf32> to vector<8x1xf32>
    %110 = vector.broadcast %109 : vector<8x1xf32> to vector<8x8xf32>
    %111 = arith.subf %107, %110 : vector<8x8xf32>
    %112 = math.exp %111 : vector<8x8xf32>
    %cst_41 = arith.constant dense<0.000000e+00> : vector<8xf32>
    %113 = vector.multi_reduction <add>, %112, %cst_41 [1] : vector<8x8xf32> to vector<8xf32>
    %114 = vector.shape_cast %113 : vector<8xf32> to vector<8x1xf32>
    %115 = tpu.reciprocal %114 {approx = true} : vector<8x1xf32> -> vector<8x1xf32>
    %116 = vector.broadcast %115 : vector<8x1xf32> to vector<8x8xf32>
    %117 = arith.mulf %112, %116 : vector<8x8xf32>
    %118 = arith.truncf %117 : vector<8x8xf32> to vector<8x8xbf16>
    %119 = arith.truncf %102 : vector<8x8xf32> to vector<8x8xbf16>
    %cst_42 = arith.constant dense<0.000000e+00> : vector<8x8xf32>
    %120 = tpu.matmul %118, %119, %cst_42 {dimension_numbers = #tpu.dot_dimension_numbers<[1], [0], [0], [1], [0, 0, 1, 1], [], []>} : vector<8x8xbf16>, vector<8x8xbf16>, vector<8x8xf32> -> vector<8x8xf32>
    %c0_43 = arith.constant 0 : index
    %c16 = arith.constant 16 : index
    %121 = vector.load %arg26[%c0_43, %c16] : memref<8x32xf32, #tpu.memory_space<vmem>>, vector<8x8xf32>
    tpu.vector_store %arg26[%c0_43, %c16], %120 {strides = array<i32>} : memref<8x32xf32, #tpu.memory_space<vmem>>, vector<8x8xf32>,
    %122 = vector.extract_strided_slice %48 {offsets = [0, 24], sizes = [8, 8], strides = [1, 1]} : vector<8x32xf32> to vector<8x8xf32>
    %123 = vector.extract_strided_slice %49 {offsets = [0, 24], sizes = [8, 8], strides = [1, 1]} : vector<8x32xf32> to vector<8x8xf32>
    %124 = vector.extract_strided_slice %50 {offsets = [0, 24], sizes = [8, 8], strides = [1, 1]} : vector<8x32xf32> to vector<8x8xf32>
    %125 = arith.truncf %122 : vector<8x8xf32> to vector<8x8xbf16>
    %126 = arith.truncf %123 : vector<8x8xf32> to vector<8x8xbf16>
    %cst_44 = arith.constant dense<0.000000e+00> : vector<8x8xf32>
    %127 = tpu.matmul %125, %126, %cst_44 {dimension_numbers = #tpu.dot_dimension_numbers<[1], [1], [0], [0], [0, 0, 1, 0], [], []>} : vector<8x8xbf16>, vector<8x8xbf16>, vector<8x8xf32> -> vector<8x8xf32>
    %cst_45 = arith.constant -1.000000e+30 : f32
    %128 = vector.broadcast %cst_45 : f32 to vector<8x8xf32>
    %129 = arith.select %55, %127, %128 : vector<8x8xi1>, vector<8x8xf32>
    %cst_46 = arith.constant dense<0xFF800000> : vector<8xf32>
    %130 = vector.multi_reduction <maximumf>, %129, %cst_46 [1] : vector<8x8xf32> to vector<8xf32>
    %131 = vector.shape_cast %130 : vector<8xf32> to vector<8x1xf32>
    %132 = vector.broadcast %131 : vector<8x1xf32> to vector<8x8xf32>
    %133 = arith.subf %129, %132 : vector<8x8xf32>
    %134 = math.exp %133 : vector<8x8xf32>
    %cst_47 = arith.constant dense<0.000000e+00> : vector<8xf32>
    %135 = vector.multi_reduction <add>, %134, %cst_47 [1] : vector<8x8xf32> to vector<8xf32>
    %136 = vector.shape_cast %135 : vector<8xf32> to vector<8x1xf32>
    %137 = tpu.reciprocal %136 {approx = true} : vector<8x1xf32> -> vector<8x1xf32>
    %138 = vector.broadcast %137 : vector<8x1xf32> to vector<8x8xf32>
    %139 = arith.mulf %134, %138 : vector<8x8xf32>
    %140 = arith.truncf %139 : vector<8x8xf32> to vector<8x8xbf16>
    %141 = arith.truncf %124 : vector<8x8xf32> to vector<8x8xbf16>
    %cst_48 = arith.constant dense<0.000000e+00> : vector<8x8xf32>
    %142 = tpu.matmul %140, %141, %cst_48 {dimension_numbers = #tpu.dot_dimension_numbers<[1], [0], [0], [1], [0, 0, 1, 1], [], []>} : vector<8x8xbf16>, vector<8x8xbf16>, vector<8x8xf32> -> vector<8x8xf32>
    %c0_49 = arith.constant 0 : index
    %c24 = arith.constant 24 : index
    %143 = vector.load %arg26[%c0_49, %c24] : memref<8x32xf32, #tpu.memory_space<vmem>>, vector<8x8xf32>
    tpu.vector_store %arg26[%c0_49, %c24], %142 {strides = array<i32>} : memref<8x32xf32, #tpu.memory_space<vmem>>, vector<8x8xf32>,
    %c0_50 = arith.constant 0 : index
    %c0_51 = arith.constant 0 : index
    %144 = vector.load %arg26[%c0_50, %c0_51] : memref<8x32xf32, #tpu.memory_space<vmem>>, vector<8x32xf32>
    %145 = arith.truncf %144 : vector<8x32xf32> to vector<8x32xbf16>
    %c0_52 = arith.constant 0 : index
    %c0_53 = arith.constant 0 : index
    %146 = vector.load %arg10[%c0_52, %c0_53] : memref<32x32xbf16, #tpu.memory_space<vmem>>, vector<32x32xbf16>
    %cst_54 = arith.constant dense<0.000000e+00> : vector<8x32xf32>
    %147 = tpu.matmul %145, %146, %cst_54 {dimension_numbers = #tpu.dot_dimension_numbers<[1], [0], [0], [1], [0, 0, 1, 1], [], []>} : vector<8x32xbf16>, vector<32x32xbf16>, vector<8x32xf32> -> vector<8x32xf32>
    %c0_55 = arith.constant 0 : index
    %c0_56 = arith.constant 0 : index
    %148 = vector.load %arg11[%c0_55, %c0_56] : memref<1x32xf32, #tpu.memory_space<vmem>>, vector<1x32xf32>
    %149 = vector.broadcast %148 : vector<1x32xf32> to vector<8x32xf32>
    %150 = arith.addf %147, %149 : vector<8x32xf32>
    %151 = arith.addf %1, %150 : vector<8x32xf32>
    %c0_57 = arith.constant 0 : index
    %c0_58 = arith.constant 0 : index
    %152 = vector.load %arg12[%c0_57, %c0_58] : memref<1x32xf32, #tpu.memory_space<vmem>>, vector<1x32xf32>
    %c0_59 = arith.constant 0 : index
    %c0_60 = arith.constant 0 : index
    %153 = vector.load %arg13[%c0_59, %c0_60] : memref<1x32xf32, #tpu.memory_space<vmem>>, vector<1x32xf32>
    %cst_61 = arith.constant dense<0.000000e+00> : vector<8xf32>
    %154 = vector.multi_reduction <add>, %151, %cst_61 [1] : vector<8x32xf32> to vector<8xf32>
    %155 = vector.shape_cast %154 : vector<8xf32> to vector<8x1xf32>
    %cst_62 = arith.constant 3.200000e+01 : f32
    %156 = vector.broadcast %cst_62 : f32 to vector<8x1xf32>
    %157 = arith.divf %155, %156 : vector<8x1xf32>
    %158 = vector.broadcast %157 : vector<8x1xf32> to vector<8x32xf32>
    %159 = arith.subf %151, %158 : vector<8x32xf32>
    %160 = arith.mulf %159, %159 : vector<8x32xf32>
    %cst_63 = arith.constant dense<0.000000e+00> : vector<8xf32>
    %161 = vector.multi_reduction <add>, %160, %cst_63 [1] : vector<8x32xf32> to vector<8xf32>
    %162 = vector.shape_cast %161 : vector<8xf32> to vector<8x1xf32>
    %cst_64 = arith.constant 3.200000e+01 : f32
    %163 = vector.broadcast %cst_64 : f32 to vector<8x1xf32>
    %164 = arith.divf %162, %163 : vector<8x1xf32>
    %cst_65 = arith.constant 9.99999974E-6 : f32
    %165 = vector.broadcast %cst_65 : f32 to vector<8x1xf32>
    %166 = arith.addf %164, %165 : vector<8x1xf32>
    %167 = math.rsqrt %166 : vector<8x1xf32>
    %168 = vector.broadcast %167 : vector<8x1xf32> to vector<8x32xf32>
    %169 = arith.mulf %159, %168 : vector<8x32xf32>
    %170 = vector.broadcast %152 : vector<1x32xf32> to vector<8x32xf32>
    %171 = arith.mulf %169, %170 : vector<8x32xf32>
    %172 = vector.broadcast %153 : vector<1x32xf32> to vector<8x32xf32>
    %173 = arith.addf %171, %172 : vector<8x32xf32>
    %174 = arith.truncf %173 : vector<8x32xf32> to vector<8x32xbf16>
    %c0_66 = arith.constant 0 : index
    %c0_67 = arith.constant 0 : index
    %175 = vector.load %arg14[%c0_66, %c0_67] : memref<32x128xbf16, #tpu.memory_space<vmem>>, vector<32x128xbf16>
    %cst_68 = arith.constant dense<0.000000e+00> : vector<8x128xf32>
    %176 = tpu.matmul %174, %175, %cst_68 {dimension_numbers = #tpu.dot_dimension_numbers<[1], [0], [0], [1], [0, 0, 1, 1], [], []>} : vector<8x32xbf16>, vector<32x128xbf16>, vector<8x128xf32> -> vector<8x128xf32>
    %c0_69 = arith.constant 0 : index
    %c0_70 = arith.constant 0 : index
    %177 = vector.load %arg15[%c0_69, %c0_70] : memref<1x128xf32, #tpu.memory_space<vmem>>, vector<1x128xf32>
    %178 = vector.broadcast %177 : vector<1x128xf32> to vector<8x128xf32>
    %179 = arith.addf %176, %178 : vector<8x128xf32>
    %cst_71 = arith.constant 5.000000e-01 : f32
    %180 = vector.broadcast %cst_71 : f32 to vector<8x128xf32>
    %181 = arith.mulf %180, %179 : vector<8x128xf32>
    %cst_72 = arith.constant 0.707106769 : f32
    %182 = vector.broadcast %cst_72 : f32 to vector<8x128xf32>
    %183 = arith.mulf %179, %182 : vector<8x128xf32>
    %184 = math.absf %183 : vector<8x128xf32>
    %cst_73 = arith.constant 0.327591091 : f32
    %185 = vector.broadcast %cst_73 : f32 to vector<8x128xf32>
    %186 = arith.mulf %185, %184 : vector<8x128xf32>
    %cst_74 = arith.constant 1.000000e+00 : f32
    %187 = vector.broadcast %cst_74 : f32 to vector<8x128xf32>
    %188 = arith.addf %187, %186 : vector<8x128xf32>
    %cst_75 = arith.constant 1.000000e+00 : f32
    %189 = vector.broadcast %cst_75 : f32 to vector<8x128xf32>
    %190 = arith.divf %189, %188 : vector<8x128xf32>
    %cst_76 = arith.constant 1.06140542 : f32
    %191 = vector.broadcast %cst_76 : f32 to vector<8x128xf32>
    %192 = arith.mulf %191, %190 : vector<8x128xf32>
    %cst_77 = arith.constant -1.45315206 : f32
    %193 = vector.broadcast %cst_77 : f32 to vector<8x128xf32>
    %194 = arith.addf %192, %193 : vector<8x128xf32>
    %195 = arith.mulf %194, %190 : vector<8x128xf32>
    %cst_78 = arith.constant 1.42141378 : f32
    %196 = vector.broadcast %cst_78 : f32 to vector<8x128xf32>
    %197 = arith.addf %195, %196 : vector<8x128xf32>
    %198 = arith.mulf %197, %190 : vector<8x128xf32>
    %cst_79 = arith.constant -0.284496725 : f32
    %199 = vector.broadcast %cst_79 : f32 to vector<8x128xf32>
    %200 = arith.addf %198, %199 : vector<8x128xf32>
    %201 = arith.mulf %200, %190 : vector<8x128xf32>
    %cst_80 = arith.constant 0.254829586 : f32
    %202 = vector.broadcast %cst_80 : f32 to vector<8x128xf32>
    %203 = arith.addf %201, %202 : vector<8x128xf32>
    %204 = arith.mulf %203, %190 : vector<8x128xf32>
    %cst_81 = arith.constant 0.000000e+00 : f32
    %205 = vector.broadcast %cst_81 : f32 to vector<8x128xf32>
    %206 = arith.subf %205, %184 : vector<8x128xf32>
    %207 = arith.mulf %206, %184 : vector<8x128xf32>
    %208 = math.exp %207 : vector<8x128xf32>
    %209 = arith.mulf %204, %208 : vector<8x128xf32>
    %cst_82 = arith.constant 1.000000e+00 : f32
    %210 = vector.broadcast %cst_82 : f32 to vector<8x128xf32>
    %211 = arith.subf %210, %209 : vector<8x128xf32>
    %cst_83 = arith.constant 0.000000e+00 : f32
    %212 = vector.broadcast %cst_83 : f32 to vector<8x128xf32>
    %213 = arith.cmpf oge, %183, %212 : vector<8x128xf32>
    %cst_84 = arith.constant 0.000000e+00 : f32
    %214 = vector.broadcast %cst_84 : f32 to vector<8x128xf32>
    %215 = arith.subf %214, %211 : vector<8x128xf32>
    %216 = arith.select %213, %211, %215 : vector<8x128xi1>, vector<8x128xf32>
    %cst_85 = arith.constant 1.000000e+00 : f32
    %217 = vector.broadcast %cst_85 : f32 to vector<8x128xf32>
    %218 = arith.addf %217, %216 : vector<8x128xf32>
    %219 = arith.mulf %181, %218 : vector<8x128xf32>
    %220 = arith.truncf %219 : vector<8x128xf32> to vector<8x128xbf16>
    %c0_86 = arith.constant 0 : index
    %c0_87 = arith.constant 0 : index
    %221 = vector.load %arg16[%c0_86, %c0_87] : memref<128x32xbf16, #tpu.memory_space<vmem>>, vector<128x32xbf16>
    %cst_88 = arith.constant dense<0.000000e+00> : vector<8x32xf32>
    %222 = tpu.matmul %220, %221, %cst_88 {dimension_numbers = #tpu.dot_dimension_numbers<[1], [0], [0], [1], [0, 0, 1, 1], [], []>} : vector<8x128xbf16>, vector<128x32xbf16>, vector<8x32xf32> -> vector<8x32xf32>
    %c0_89 = arith.constant 0 : index
    %c0_90 = arith.constant 0 : index
    %223 = vector.load %arg17[%c0_89, %c0_90] : memref<1x32xf32, #tpu.memory_space<vmem>>, vector<1x32xf32>
    %224 = vector.broadcast %223 : vector<1x32xf32> to vector<8x32xf32>
    %225 = arith.addf %222, %224 : vector<8x32xf32>
    %226 = arith.addf %151, %225 : vector<8x32xf32>
    %c0_91 = arith.constant 0 : index
    %c0_92 = arith.constant 0 : index
    %c0_93 = arith.constant 0 : index
    %227 = vector.load %arg24[%c0_91, %c0_92, %c0_93] : memref<1x8x32xf32, #tpu.memory_space<vmem>>, vector<1x8x32xf32>
    %228 = vector.shape_cast %227 : vector<1x8x32xf32> to vector<8x32xf32>
    %229 = vector.shape_cast %226 : vector<8x32xf32> to vector<1x8x32xf32>
    tpu.vector_store %arg24[%c0_91, %c0_92, %c0_93], %229 {strides = array<i32>} : memref<1x8x32xf32, #tpu.memory_space<vmem>>, vector<1x8x32xf32>,
    return
  }
  func.func @transform_0(%arg0: i32, %arg1: i32) -> (i32, i32, i32) {
    %c0_i32 = arith.constant 0 : i32
    %c0_i32_0 = arith.constant 0 : i32
    return %arg0, %arg1, %c0_i32 : i32, i32, i32
  }
  func.func @transform_1(%arg0: i32, %arg1: i32) -> (i32, i32, i32) {
    %c0_i32 = arith.constant 0 : i32
    %c0_i32_0 = arith.constant 0 : i32
    %c0_i32_1 = arith.constant 0 : i32
    return %arg0, %c0_i32, %c0_i32_0 : i32, i32, i32
  }
  func.func @transform_2(%arg0: i32, %arg1: i32) -> (i32, i32) {
    %c0_i32 = arith.constant 0 : i32
    %c0_i32_0 = arith.constant 0 : i32
    %c0_i32_1 = arith.constant 0 : i32
    return %c0_i32, %c0_i32_0 : i32, i32
  }
  func.func @transform_3(%arg0: i32, %arg1: i32) -> (i32, i32) {
    %c0_i32 = arith.constant 0 : i32
    %c0_i32_0 = arith.constant 0 : i32
    %c0_i32_1 = arith.constant 0 : i32
    return %c0_i32, %c0_i32_0 : i32, i32
  }
  func.func @transform_4(%arg0: i32, %arg1: i32) -> (i32, i32) {
    %c0_i32 = arith.constant 0 : i32
    %c0_i32_0 = arith.constant 0 : i32
    %c0_i32_1 = arith.constant 0 : i32
    return %c0_i32, %c0_i32_0 : i32, i32
  }
  func.func @transform_5(%arg0: i32, %arg1: i32) -> (i32, i32) {
    %c0_i32 = arith.constant 0 : i32
    %c0_i32_0 = arith.constant 0 : i32
    %c0_i32_1 = arith.constant 0 : i32
    return %c0_i32, %c0_i32_0 : i32, i32
  }
  func.func @transform_6(%arg0: i32, %arg1: i32) -> (i32, i32) {
    %c0_i32 = arith.constant 0 : i32
    %c0_i32_0 = arith.constant 0 : i32
    %c0_i32_1 = arith.constant 0 : i32
    return %c0_i32, %c0_i32_0 : i32, i32
  }
  func.func @transform_7(%arg0: i32, %arg1: i32) -> (i32, i32) {
    %c0_i32 = arith.constant 0 : i32
    %c0_i32_0 = arith.constant 0 : i32
    %c0_i32_1 = arith.constant 0 : i32
    return %c0_i32, %c0_i32_0 : i32, i32
  }
  func.func @transform_8(%arg0: i32, %arg1: i32) -> (i32, i32) {
    %c0_i32 = arith.constant 0 : i32
    %c0_i32_0 = arith.constant 0 : i32
    %c0_i32_1 = arith.constant 0 : i32
    return %c0_i32, %c0_i32_0 : i32, i32
  }
  func.func @transform_9(%arg0: i32, %arg1: i32) -> (i32, i32) {
    %c0_i32 = arith.constant 0 : i32
    %c0_i32_0 = arith.constant 0 : i32
    %c0_i32_1 = arith.constant 0 : i32
    return %c0_i32, %c0_i32_0 : i32, i32
  }
  func.func @transform_10(%arg0: i32, %arg1: i32) -> (i32, i32) {
    %c0_i32 = arith.constant 0 : i32
    %c0_i32_0 = arith.constant 0 : i32
    %c0_i32_1 = arith.constant 0 : i32
    return %c0_i32, %c0_i32_0 : i32, i32
  }
  func.func @transform_11(%arg0: i32, %arg1: i32) -> (i32, i32) {
    %c0_i32 = arith.constant 0 : i32
    %c0_i32_0 = arith.constant 0 : i32
    %c0_i32_1 = arith.constant 0 : i32
    return %c0_i32, %c0_i32_0 : i32, i32
  }
  func.func @transform_12(%arg0: i32, %arg1: i32) -> (i32, i32) {
    %c0_i32 = arith.constant 0 : i32
    %c0_i32_0 = arith.constant 0 : i32
    %c0_i32_1 = arith.constant 0 : i32
    return %c0_i32, %c0_i32_0 : i32, i32
  }
  func.func @transform_13(%arg0: i32, %arg1: i32) -> (i32, i32) {
    %c0_i32 = arith.constant 0 : i32
    %c0_i32_0 = arith.constant 0 : i32
    %c0_i32_1 = arith.constant 0 : i32
    return %c0_i32, %c0_i32_0 : i32, i32
  }
  func.func @transform_14(%arg0: i32, %arg1: i32) -> (i32, i32) {
    %c0_i32 = arith.constant 0 : i32
    %c0_i32_0 = arith.constant 0 : i32
    %c0_i32_1 = arith.constant 0 : i32
    return %c0_i32, %c0_i32_0 : i32, i32
  }
  func.func @transform_15(%arg0: i32, %arg1: i32) -> (i32, i32) {
    %c0_i32 = arith.constant 0 : i32
    %c0_i32_0 = arith.constant 0 : i32
    %c0_i32_1 = arith.constant 0 : i32
    return %c0_i32, %c0_i32_0 : i32, i32
  }
  func.func @transform_16(%arg0: i32, %arg1: i32) -> (i32, i32) {
    %c0_i32 = arith.constant 0 : i32
    %c0_i32_0 = arith.constant 0 : i32
    return %arg1, %c0_i32 : i32, i32
  }
  func.func @transform_17(%arg0: i32, %arg1: i32) -> (i32, i32) {
    %c0_i32 = arith.constant 0 : i32
    %c0_i32_0 = arith.constant 0 : i32
    return %arg1, %c0_i32 : i32, i32
  }
  func.func @transform_18(%arg0: i32, %arg1: i32) -> (i32, i32) {
    %c0_i32 = arith.constant 0 : i32
    %c0_i32_0 = arith.constant 0 : i32
    return %arg1, %c0_i32 : i32, i32
  }
  func.func @transform_19(%arg0: i32, %arg1: i32) -> (i32, i32) {
    %c0_i32 = arith.constant 0 : i32
    %c0_i32_0 = arith.constant 0 : i32
    %c0_i32_1 = arith.constant 0 : i32
    return %c0_i32, %c0_i32_0 : i32, i32
  }
  func.func @transform_20(%arg0: i32, %arg1: i32) -> (i32, i32) {
    %c0_i32 = arith.constant 0 : i32
    %c0_i32_0 = arith.constant 0 : i32
    %c0_i32_1 = arith.constant 0 : i32
    return %c0_i32, %c0_i32_0 : i32, i32
  }
  func.func @transform_21(%arg0: i32, %arg1: i32) -> (i32, i32) {
    %c0_i32 = arith.constant 0 : i32
    %c0_i32_0 = arith.constant 0 : i32
    %c0_i32_1 = arith.constant 0 : i32
    return %c0_i32, %c0_i32_0 : i32, i32
  }
  func.func @transform_22(%arg0: i32, %arg1: i32) -> (i32, i32, i32) {
    %c0_i32 = arith.constant 0 : i32
    %c0_i32_0 = arith.constant 0 : i32
    return %arg0, %arg1, %c0_i32 : i32, i32, i32
  }
}

</mosaic_0001>

<bundles_post_ra>
// kernel: tpu_custom_call.1
= control target key start
LH: loop header
LB: loop body
LE: loop exit
PB: predicated region body
PF: predicated region fallthrough
CT: control target
= control target key end

     0   :  { %s3658_s0 = inlined_call_operand.vmem [shape: f32[2,8,32], index: 0, kind: input, shape index: {}]   ;;  %s3659_s1 = inlined_call_operand.vmem [shape: f32[2,8,32], index: 1, kind: input, shape index: {}]   ;;  %s3660_s2 = inlined_call_operand.hbm [shape: f32[1,32], index: 2, kind: input, shape index: {}]   ;;  %s3661_s3 = inlined_call_operand.hbm [shape: f32[1,32], index: 3, kind: input, shape index: {}]   ;;  %s3662_s4 = inlined_call_operand.vmem [shape: bf16[32,32], index: 4, kind: input, shape index: {}]   ;;  %s3663_s5 = inlined_call_operand.hbm [shape: f32[1,32], index: 5, kind: input, shape index: {}]   ;;  %s3664_s6 = inlined_call_operand.vmem [shape: bf16[32,64], index: 6, kind: input, shape index: {}]   ;;  %s3665_s7 = inlined_call_operand.hbm [shape: f32[1,64], index: 7, kind: input, shape index: {}]   ;;  %s3666_s8 = inlined_call_operand.vmem [shape: bf16[32,32], index: 8, kind: input, shape index: {}]   ;;  %s3667_s9 = inlined_call_operand.hbm [shape: f32[1,32], index: 9, kind: input, shape index: {}]   ;;  %s3668_s10 = inlined_call_operand.hbm [shape: f32[1,32], index: 10, kind: input, shape index: {}]   ;;  %s3669_s11 = inlined_call_operand.hbm [shape: f32[1,32], index: 11, kind: input, shape index: {}]   ;;  %s3670_s12 = inlined_call_operand.vmem [shape: bf16[32,128], index: 12, kind: input, shape index: {}]   ;;  %s3671_s13 = inlined_call_operand.hbm [shape: f32[1,128], index: 13, kind: input, shape index: {}]   ;;  %s3672_s14 = inlined_call_operand.vmem [shape: bf16[128,32], index: 14, kind: input, shape index: {}]   ;;  %s3673_s15 = inlined_call_operand.hbm [shape: f32[1,32], index: 15, kind: input, shape index: {}]   ;;  %s3674_s16 = inlined_call_operand.vmem [shape: f32[8,32], index: 16, kind: input, shape index: {}]   ;;  %s3675_s17 = inlined_call_operand.vmem [shape: f32[8,32], index: 17, kind: input, shape index: {}]   ;;  %s3676_s18 = inlined_call_operand.vmem [shape: f32[8,32], index: 18, kind: input, shape index: {}]   ;;  %s3677_s19 = inlined_call_operand.vmem [shape: f32[8,32], index: 19, kind: input, shape index: {}]   ;;  %s3678_s20 = inlined_call_operand.vmem [shape: f32[8,32], index: 20, kind: input, shape index: {}]   ;;  %s3679_s21 = inlined_call_operand.hbm [shape: f32[8,32], index: 21, kind: input, shape index: {}]   ;;  %s3680_s22 = inlined_call_operand.hbm [shape: f32[2,8,32], index: 22, kind: output, shape index: {}]  }
   0x1   :  { %3704 = sst [smem:[#allocation38_spill]] %s3658_s0 }
   0x2   :  { %3705 = sst [smem:[#allocation39_spill]] %s3659_s1 }
   0x3   :  { %3706 = sst [smem:[#allocation40_spill]] %s3660_s2 }
   0x4   :  { %3707 = sst [smem:[#allocation41_spill]] %s3661_s3 }
   0x5   :  { %3708 = sst [smem:[#allocation42_spill]] %s3662_s4 }
   0x6   :  { %3709 = sst [smem:[#allocation43_spill]] %s3663_s5 }
   0x7   :  { %3710 = sst [smem:[#allocation44_spill]] %s3664_s6 }
   0x8   :  { %3711 = sst [smem:[#allocation45_spill]] %s3665_s7 }
   0x9   :  { %3712 = sst [smem:[#allocation46_spill]] %s3668_s10 }
   0xa   :  { %3713 = sst [smem:[#allocation47_spill]] %s3670_s12 }
   0xb   :  { %3714 = sst [smem:[#allocation48_spill]] %s3672_s14 }
   0xc   :  { %3715 = sst [smem:[#allocation49_spill]] %s3680_s22 }
   0xd   :  { %27 = vsyncpa [#allocation5], 0 }
   0xe   :  { %28 = vsyncpa [#allocation8], 0 }
   0xf   :  { %29 = vsyncpa [#allocation11], 0 }
  0x10   :  { %30 = vsyncpa [#allocation14], 0 }
  0x11   :  { %31 = vsyncpa [#allocation17], 0 }
  0x12   :  { %32 = vsyncpa [#allocation20], 0 }
  0x13   :  { %33 = vsyncpa [#allocation6], 0 }
  0x14   :  { %35 = vsyncpa [#allocation6 + $0x1], 0  ;;  %s3126_s3 = smov 0   ;;  %s3128_s28 = smov 0  }
  0x15   :  { %s3130_s29 = smov 0   ;;  %s3132_s30 = smov 0  }
  0x16   :  { %s3134_s4 = smov 0   ;;  %s3136_s0 = smov 0  }
  0x17 LB: > { %3716 = sst [smem:[#allocation29_spill]] %s2962_s3  ;;  %s2175_s23 = sadd.s32 4294967295, %s2982_s0   ;;  %s2982_s0 = sphi %s3136_s0, %s41_s0   ;;  %s2978_s4 = sphi %s3134_s4, %s3761_s4   ;;  %s2974_s30 = sphi %s3132_s30, %s3760_s30   ;;  %s2970_s29 = sphi %s3130_s29, %s3759_s29   ;;  %s2966_s28 = sphi %s3128_s28, %s3758_s28   ;;  %s2962_s3 = sphi %s3126_s3, %s3757_s3  }
  0x18   : > { %3717 = sst [smem:[#allocation30_spill]] %s2966_s28  ;;  %s2176_s1 = sadd.s32 4294967294, %s2982_s0  }
  0x19   : > { %3718 = sst [smem:[#allocation31_spill]] %s2970_s29  ;;  %s53_s5 = sadd.s32 1, %s2978_s4 }
  0x1a   : > { %3719 = sst [smem:[#allocation32_spill]] %s2978_s4  ;;  %s551_s24 = sadd.s32 1, %s2970_s29 }
  0x1b   : > { %3720 = sst [smem:[#allocation33_spill]] %s2982_s0  ;;  %p55_p0 = scmp.ge.s32.totalorder %s53_s5, 2 }
  0x1c   : > { %p561_p1 = scmp.ne.s32.totalorder %s2970_s29, %s2966_s28  ;;  %p562_p2 = scmp.eq.s32.totalorder %s2175_s23, 1 }
  0x1d   : > { %p567_p3 = scmp.ne.s32.totalorder %s2966_s28, %s2962_s3  ;;  %s3763_s5 = smov (%p55_p0, %s53_s5), 0 }
  0x1e   : > { %3721 = sst [smem:[#allocation34_spill]] %s3763_s5  ;;  %p3166_p4 = por %p562_p2, %p561_p1 }
  0x1f   : > { %p568_p5 = scmp.eq.s32.totalorder %s2176_s1, 1  ;;  %s546_s25 = ssub.s32 %s2978_s4, %s3763_s5 }
  0x20   : > { %s3722_s6 = scalar_select %p3166_p4, 1, 0 }
  0x21   : > { %p2177_p6 = scmp.ge.s32.totalorder %s2982_s0, 1  ;;  %p549_p7 = scmp.eq.s32.totalorder %s546_s25, 0 }
  0x22   : > { %3723 = sst [smem:[#allocation35_spill]] %s3722_s6  ;;  %p3173_p8 = por %p568_p5, %p567_p3 }
  0x23   : > { %p575_p9 = scmp.lt.s32.totalorder %s2982_s0, 3  ;;  %p3185_p11 = scmp.eq.s32.totalorder %s2175_s23, 0 }
  0x24   : > { %s3724_s26 = scalar_select %p3173_p8, 1, 0 }
  0x25   : > { %s3179_s2 = scalar_select %p549_p7, %s2970_s29, %s551_s24  }
  0x26   : > { %3725 = sst [smem:[#allocation36_spill]] %s3724_s26  ;;  %p3181_p10 = pnand %p2177_p6, %p575_p9 }
  0x27   : > { %3726 = sst [smem:[#allocation37_spill]] %s3179_s2  ;;  %s2984_s1 = smov [#allocation7]  }
  0x28   : > { %s3727_s27 = scalar_select %p3181_p10, 1, 0 }
  0x29   : > { %s3728_s3 = scalar_select %p3185_p11, 1, 0 }
  0x2a   : > { %p2428_p12 = pneg %p3181_p10  ;;  %s599_s25 = sshll.u32 %s2984_s1, 4  ;;  %s600_s25 = int_to_ptr.vmem [resolvable:$true] %s599_s25 }
  0x2b   : > { %s2985_s5 = smov [#allocation10]   ;;  %s2986_s23 = smov [#allocation13]  }
  0x2c   : > { %s627_s4 = sshll.u32 %s2985_s5, 4  ;;  %p3193_p13 = pnand %p3185_p11, %p2428_p12  ;;  %s3197_s4 = int_to_ptr.vmem [resolvable:$true] %s627_s4 }
  0x2d   : > { %s3199_s2 = sshll.u32 %s2986_s23, 4  ;;  %s3730_s0 = sld [smem:[#allocation41_spill]]  ;;  %s653_s2 = int_to_ptr.vmem [resolvable:$true] %s3199_s2 }
  0x2e   : > { %p3209_p1 = pneg %p3193_p13 }
  0x33   : > { %s3731_s22 = smov %s3730_s0  ;;  %s2600_s6 = scalar_lea.hbm %s3730_s0, 16 }
  0x34   : > { %p2601_p0 = scmp.ne.s32.totalorder %s3731_s22, %s2600_s6  ;;  %p2607_p5 = scmp.lt.u32.totalorder %s2600_s6, %s3731_s22 }
  0x36   : > { %p2603_p2 = pnand %p3209_p1, %p2601_p0 }
  0x38   : > { %p2604_p3 = pneg %p2603_p2 }
  0x3a   : > { %p2609_p6 = pnand %p2607_p5, %p2604_p3 }
  0x3c   : > { %2612 = shalt.err (!%p2609_p6)
}
  0x3d   : > { %s2613_s29 = scalar_lea.vmem %s600_s25, 16  ;;  %s2620_s28 = scalar_lea.vmem %s600_s25, 32 }
  0x3e   : > { %p2614_p7 = scmp.ne.s32.totalorder %s600_s25, %s2613_s29  ;;  %p2621_p8 = scmp.lt.s32.totalorder %s600_s25, %s600_s25 }
  0x3f   : > { %p2622_p4 = scmp.lt.s32.totalorder %s2620_s28, %s2613_s29 }
  0x40   : > { %p2616_p9 = pnand %p2614_p7, %p3209_p1 }
  0x41   : > { %p2623_p11 = por %p2622_p4, %p2621_p8 }
  0x42   : > { %p2617_p12 = pneg %p2616_p9 }
  0x44   : > { %p2624_p10 = pnand %p2623_p11, %p2617_p12 }
  0x46   : > { %2627 = shalt.err (!%p2624_p10)
}
  0x47   : > { %2434 = dma.hbm_to_vmem [thread:$0]  (!%p3193_p13), %s3731_s22, 16, %s600_s25, [#allocation8]  }
  0x48   : > { %s3733_s7 = sld [smem:[#allocation45_spill]] }
  0x4e   : > { %s2628_s1 = scalar_lea.hbm %s3733_s7, 16 }
  0x4f   : > { %p2629_p0 = scmp.ne.s32.totalorder %s3733_s7, %s2628_s1  ;;  %p2635_p8 = scmp.lt.u32.totalorder %s2628_s1, %s3733_s7 }
  0x51   : > { %p2631_p2 = pnand %p2629_p0, %p3209_p1 }
  0x53   : > { %p2632_p4 = pneg %p2631_p2 }
  0x55   : > { %p2637_p10 = pnand %p2635_p8, %p2632_p4 }
  0x57   : > { %2640 = shalt.err (!%p2637_p10)
}
  0x58   : > { %s2641_s25 = scalar_lea.vmem %s3197_s4, 16  ;;  %s2648_s12 = scalar_lea.vmem %s3197_s4, 32 }
  0x59   : > { %p2642_p11 = scmp.ne.s32.totalorder %s3197_s4, %s2641_s25  ;;  %p2649_p6 = scmp.lt.s32.totalorder %s3197_s4, %s3197_s4 }
  0x5a   : > { %p2650_p7 = scmp.lt.s32.totalorder %s2648_s12, %s2641_s25 }
  0x5b   : > { %p2644_p3 = pnand %p2642_p11, %p3209_p1 }
  0x5c   : > { %p2651_p9 = por %p2650_p7, %p2649_p6 }
  0x5d   : > { %p2645_p5 = pneg %p2644_p3 }
  0x5f   : > { %p2652_p12 = pnand %p2651_p9, %p2645_p5 }
  0x61   : > { %2655 = shalt.err (!%p2652_p12)
}
  0x62   : > { %2440 = dma.hbm_to_vmem [thread:$0]  (!%p3193_p13), %s3733_s7, 16, %s3197_s4, [#allocation11]  }
  0x63   : > { %s2987_s14 = smov [#allocation16]   ;;  %s3734_s10 = sld [smem:[#allocation46_spill]] }
  0x64   : > { %s677_s6 = sshll.u32 %s2987_s14, 4  ;;  %s678_s6 = int_to_ptr.vmem [resolvable:$true] %s677_s6 }
  0x69   : > { %s2656_s29 = scalar_lea.hbm %s3734_s10, 16 }
  0x6a   : > { %p2657_p0 = scmp.ne.s32.totalorder %s3734_s10, %s2656_s29  ;;  %p2663_p8 = scmp.lt.u32.totalorder %s2656_s29, %s3734_s10 }
  0x6c   : > { %p2659_p2 = pnand %p2657_p0, %p3209_p1 }
  0x6e   : > { %p2660_p4 = pneg %p2659_p2 }
  0x70   : > { %p2665_p10 = pnand %p2663_p8, %p2660_p4 }
  0x72   : > { %2668 = shalt.err (!%p2665_p10)
}
  0x73   : > { %s2669_s4 = scalar_lea.vmem %s653_s2, 16  ;;  %s2676_s0 = scalar_lea.vmem %s653_s2, 32 }
  0x74   : > { %p2670_p11 = scmp.ne.s32.totalorder %s653_s2, %s2669_s4  ;;  %p2677_p6 = scmp.lt.s32.totalorder %s653_s2, %s653_s2 }
  0x75   : > { %p2678_p7 = scmp.lt.s32.totalorder %s2676_s0, %s2669_s4 }
  0x76   : > { %p2672_p3 = pnand %p2670_p11, %p3209_p1 }
  0x77   : > { %p2679_p9 = por %p2678_p7, %p2677_p6 }
  0x78   : > { %p2673_p5 = pneg %p2672_p3 }
  0x7a   : > { %p2680_p12 = pnand %p2679_p9, %p2673_p5 }
  0x7c   : > { %2683 = shalt.err (!%p2680_p12)
}
  0x7d   : > { %2446 = dma.hbm_to_vmem [thread:$0]  (!%p3193_p13), %s3734_s10, 16, %s653_s2, [#allocation14]  }
  0x7e   : > { %s2684_s23 = scalar_lea.hbm %s3671_s13, 16 }
  0x7f   : > { %p2685_p0 = scmp.ne.s32.totalorder %s3671_s13, %s2684_s23  ;;  %p2691_p8 = scmp.lt.u32.totalorder %s2684_s23, %s3671_s13 }
  0x81   : > { %p2687_p2 = pnand %p2685_p0, %p3209_p1 }
  0x83   : > { %p2688_p4 = pneg %p2687_p2 }
  0x85   : > { %p2693_p10 = pnand %p2691_p8, %p2688_p4 }
  0x87   : > { %2696 = shalt.err (!%p2693_p10)
}
  0x88   : > { %s2697_s4 = scalar_lea.vmem %s678_s6, 16  ;;  %s2704_s2 = scalar_lea.vmem %s678_s6, 32 }
  0x89   : > { %p2698_p11 = scmp.ne.s32.totalorder %s678_s6, %s2697_s4  ;;  %p2705_p6 = scmp.lt.s32.totalorder %s678_s6, %s678_s6 }
  0x8a   : > { %p2706_p7 = scmp.lt.s32.totalorder %s2704_s2, %s2697_s4 }
  0x8b   : > { %p2700_p3 = pnand %p2698_p11, %p3209_p1 }
  0x8c   : > { %p2707_p9 = por %p2706_p7, %p2705_p6 }
  0x8d   : > { %p2701_p5 = pneg %p2700_p3 }
  0x8f   : > { %p2708_p12 = pnand %p2707_p9, %p2701_p5 }
  0x91   : > { %2711 = shalt.err (!%p2708_p12)
}
  0x92   : > { %2452 = dma.hbm_to_vmem [thread:$0]  (!%p3193_p13), %s3671_s13, 16, %s678_s6, [#allocation17]  }
  0x93   : > { %s2988_s14 = smov [#allocation4]   ;;  %s2989_s1 = smov [#allocation9]  }
  0x94   : > { %s588_s22 = sshll.u32 %s2988_s14, 4  ;;  %s613_s23 = sshll.u32 %s2989_s1, 4  ;;  %s589_s22 = int_to_ptr.vmem [resolvable:$true] %s588_s22  ;;  %s614_s23 = int_to_ptr.vmem [resolvable:$true] %s613_s23 }
  0x95   : > { %s3735_s25 = sld [smem:[#allocation40_spill]] }
  0x9b   : > { %s2712_s12 = scalar_lea.hbm %s3735_s25, 16 }
  0x9c   : > { %p2713_p0 = scmp.ne.s32.totalorder %s3735_s25, %s2712_s12  ;;  %p2719_p8 = scmp.lt.u32.totalorder %s2712_s12, %s3735_s25 }
  0x9e   : > { %p2715_p2 = pnand %p2713_p0, %p3209_p1 }
  0xa0   : > { %p2716_p4 = pneg %p2715_p2 }
  0xa2   : > { %p2721_p10 = pnand %p2719_p8, %p2716_p4 }
  0xa4   : > { %2724 = shalt.err (!%p2721_p10)
}
  0xa5   : > { %s2725_s6 = scalar_lea.vmem %s589_s22, 16  ;;  %s2732_s26 = scalar_lea.vmem %s589_s22, 32 }
  0xa6   : > { %p2726_p11 = scmp.ne.s32.totalorder %s589_s22, %s2725_s6  ;;  %p2733_p6 = scmp.lt.s32.totalorder %s589_s22, %s589_s22 }
  0xa7   : > { %p2734_p7 = scmp.lt.s32.totalorder %s2732_s26, %s2725_s6 }
  0xa8   : > { %p2728_p3 = pnand %p2726_p11, %p3209_p1 }
  0xa9   : > { %p2735_p9 = por %p2734_p7, %p2733_p6 }
  0xaa   : > { %p2729_p5 = pneg %p2728_p3 }
  0xac   : > { %p2736_p12 = pnand %p2735_p9, %p2729_p5 }
  0xae   : > { %2739 = shalt.err (!%p2736_p12)
}
  0xaf   : > { %2431 = dma.hbm_to_vmem [thread:$0]  (!%p3193_p13), %s3735_s25, 16, %s589_s22, [#allocation5]  }
  0xb0   : > { %s3736_s28 = sld [smem:[#allocation43_spill]] }
  0xb6   : > { %s3737_s12 = smov %s3736_s28  ;;  %s2740_s4 = scalar_lea.hbm %s3736_s28, 16 }
  0xb7   : > { %p2741_p0 = scmp.ne.s32.totalorder %s3737_s12, %s2740_s4  ;;  %p2747_p8 = scmp.lt.u32.totalorder %s2740_s4, %s3737_s12 }
  0xb9   : > { %p2743_p2 = pnand %p2741_p0, %p3209_p1 }
  0xbb   : > { %p2744_p4 = pneg %p2743_p2 }
  0xbd   : > { %p2749_p10 = pnand %p2747_p8, %p2744_p4 }
  0xbf   : > { %2752 = shalt.err (!%p2749_p10)
}
  0xc0   : > { %s2753_s14 = scalar_lea.vmem %s614_s23, 16  ;;  %s2760_s22 = scalar_lea.vmem %s614_s23, 32 }
  0xc1   : > { %p2754_p11 = scmp.ne.s32.totalorder %s614_s23, %s2753_s14  ;;  %p2761_p6 = scmp.lt.s32.totalorder %s614_s23, %s614_s23 }
  0xc2   : > { %p2762_p7 = scmp.lt.s32.totalorder %s2760_s22, %s2753_s14 }
  0xc3   : > { %p2756_p3 = pnand %p2754_p11, %p3209_p1 }
  0xc4   : > { %p2763_p9 = por %p2762_p7, %p2761_p6 }
  0xc5   : > { %p2757_p5 = pneg %p2756_p3 }
  0xc7   : > { %p2764_p12 = pnand %p2763_p9, %p2757_p5 }
  0xc9   : > { %2767 = shalt.err (!%p2764_p12)
}
  0xca   : > { %2437 = dma.hbm_to_vmem [thread:$0]  (!%p3193_p13), %s3737_s12, 16, %s614_s23, [#allocation8]  }
  0xcb   : > { %s2990_s29 = smov [#allocation12]   ;;  %s2991_s4 = smov [#allocation15]  }
  0xcc   : > { %s641_s28 = sshll.u32 %s2990_s29, 4  ;;  %s663_s2 = sshll.u32 %s2991_s4, 4  ;;  %s642_s28 = int_to_ptr.vmem [resolvable:$true] %s641_s28  ;;  %s664_s2 = int_to_ptr.vmem [resolvable:$true] %s663_s2 }
  0xcd   : > { %s2768_s26 = scalar_lea.hbm %s3667_s9, 16 }
  0xce   : > { %p2769_p0 = scmp.ne.s32.totalorder %s3667_s9, %s2768_s26  ;;  %p2775_p8 = scmp.lt.u32.totalorder %s2768_s26, %s3667_s9 }
  0xd0   : > { %p2771_p2 = pnand %p2769_p0, %p3209_p1 }
  0xd2   : > { %p2772_p4 = pneg %p2771_p2 }
  0xd4   : > { %p2777_p10 = pnand %p2775_p8, %p2772_p4 }
  0xd6   : > { %2780 = shalt.err (!%p2777_p10)
}
  0xd7   : > { %s2781_s23 = scalar_lea.vmem %s642_s28, 16  ;;  %s2788_s7 = scalar_lea.vmem %s642_s28, 32 }
  0xd8   : > { %p2782_p11 = scmp.ne.s32.totalorder %s642_s28, %s2781_s23  ;;  %p2789_p6 = scmp.lt.s32.totalorder %s642_s28, %s642_s28 }
  0xd9   : > { %p2790_p7 = scmp.lt.s32.totalorder %s2788_s7, %s2781_s23 }
  0xda   : > { %p2784_p3 = pnand %p2782_p11, %p3209_p1 }
  0xdb   : > { %p2791_p9 = por %p2790_p7, %p2789_p6 }
  0xdc   : > { %p2785_p5 = pneg %p2784_p3 }
  0xde   : > { %p2792_p12 = pnand %p2791_p9, %p2785_p5 }
  0xe0   : > { %2795 = shalt.err (!%p2792_p12)
}
  0xe1   : > { %2443 = dma.hbm_to_vmem [thread:$0]  (!%p3193_p13), %s3667_s9, 16, %s642_s28, [#allocation11]  }
  0xe2   : > { %s2796_s6 = scalar_lea.hbm %s3669_s11, 16 }
  0xe3   : > { %p2797_p0 = scmp.ne.s32.totalorder %s3669_s11, %s2796_s6  ;;  %p2803_p8 = scmp.lt.u32.totalorder %s2796_s6, %s3669_s11 }
  0xe5   : > { %p2799_p2 = pnand %p2797_p0, %p3209_p1 }
  0xe7   : > { %p2800_p4 = pneg %p2799_p2 }
  0xe9   : > { %p2805_p10 = pnand %p2803_p8, %p2800_p4 }
  0xeb   : > { %2808 = shalt.err (!%p2805_p10)
}
  0xec   : > { %s2809_s23 = scalar_lea.vmem %s664_s2, 16  ;;  %s2816_s28 = scalar_lea.vmem %s664_s2, 32 }
  0xed   : > { %p2810_p11 = scmp.ne.s32.totalorder %s664_s2, %s2809_s23  ;;  %p2817_p6 = scmp.lt.s32.totalorder %s664_s2, %s664_s2 }
  0xee   : > { %p2818_p7 = scmp.lt.s32.totalorder %s2816_s28, %s2809_s23 }
  0xef   : > { %p2812_p3 = pnand %p2810_p11, %p3209_p1 }
  0xf0   : > { %p2819_p9 = por %p2818_p7, %p2817_p6 }
  0xf1   : > { %p2813_p5 = pneg %p2812_p3 }
  0xf3   : > { %p2820_p12 = pnand %p2819_p9, %p2813_p5 }
  0xf5   : > { %2823 = shalt.err (!%p2820_p12)
}
  0xf6   : > { %2449 = dma.hbm_to_vmem [thread:$0]  (!%p3193_p13), %s3669_s11, 16, %s664_s2, [#allocation14]  }
  0xf7   : > { %s2992_s4 = smov [#allocation18]   ;;  %s2993_s0 = smov [#allocation19]  }
  0xf8   : > { %s691_s10 = sshll.u32 %s2992_s4, 4  ;;  %s729_s6 = sshll.u32 %s2993_s0, 4  ;;  %s692_s10 = int_to_ptr.vmem [resolvable:$true] %s691_s10  ;;  %s730_s6 = int_to_ptr.vmem [resolvable:$true] %s729_s6 }
  0xf9   : > { %s2824_s22 = scalar_lea.hbm %s3673_s15, 16 }
  0xfa   : > { %p2825_p0 = scmp.ne.s32.totalorder %s3673_s15, %s2824_s22  ;;  %p2831_p8 = scmp.lt.u32.totalorder %s2824_s22, %s3673_s15 }
  0xfc   : > { %p2827_p2 = pnand %p2825_p0, %p3209_p1 }
  0xfe   : > { %p2828_p4 = pneg %p2827_p2 }
 0x100   : > { %p2833_p10 = pnand %p2831_p8, %p2828_p4 }
 0x102   : > { %2836 = shalt.err (!%p2833_p10)
}
 0x103   : > { %s2837_s2 = scalar_lea.vmem %s692_s10, 16  ;;  %s2844_s29 = scalar_lea.vmem %s692_s10, 32 }
 0x104   : > { %p2838_p11 = scmp.ne.s32.totalorder %s692_s10, %s2837_s2  ;;  %p2845_p6 = scmp.lt.s32.totalorder %s692_s10, %s692_s10 }
 0x105   : > { %p2846_p7 = scmp.lt.s32.totalorder %s2844_s29, %s2837_s2 }
 0x106   : > { %p2840_p3 = pnand %p2838_p11, %p3209_p1 }
 0x107   : > { %p2847_p9 = por %p2846_p7, %p2845_p6 }
 0x108   : > { %p2841_p5 = pneg %p2840_p3 }
 0x10a   : > { %p2848_p12 = pnand %p2847_p9, %p2841_p5 }
 0x10c   : > { %2851 = shalt.err (!%p2848_p12)
}
 0x10d   : > { %2455 = dma.hbm_to_vmem [thread:$0]  (!%p3193_p13), %s3673_s15, 16, %s692_s10, [#allocation17]  }
 0x10e   : > { %s2852_s22 = scalar_lea.hbm %s3679_s21, 128 }
 0x10f   : > { %p2853_p0 = scmp.ne.s32.totalorder %s3679_s21, %s2852_s22  ;;  %p2859_p8 = scmp.lt.u32.totalorder %s2852_s22, %s3679_s21 }
 0x111   : > { %p2855_p2 = pnand %p2853_p0, %p3209_p1 }
 0x113   : > { %p2856_p4 = pneg %p2855_p2 }
 0x115   : > { %p2861_p10 = pnand %p2859_p8, %p2856_p4 }
 0x117   : > { %2864 = shalt.err (!%p2861_p10)
}
 0x118   : > { %s2865_s2 = scalar_lea.vmem %s730_s6, 128  ;;  %p2873_p6 = scmp.lt.s32.totalorder %s730_s6, %s730_s6 }
 0x119   : > { %p2866_p11 = scmp.ne.s32.totalorder %s730_s6, %s2865_s2  ;;  %p2874_p7 = scmp.lt.s32.totalorder %s2865_s2, %s2865_s2 }
 0x11b   : > { %p2868_p3 = pnand %p2866_p11, %p3209_p1  ;;  %p2875_p9 = por %p2874_p7, %p2873_p6 }
 0x11d   : > { %p2869_p5 = pneg %p2868_p3 }
 0x11f   : > { %p2876_p12 = pnand %p2875_p9, %p2869_p5 }
 0x121   : > { %2879 = shalt.err (!%p2876_p12)
}
 0x122   : > { %2458 = dma.hbm_to_vmem [thread:$0]  (!%p3193_p13), %s3679_s21, 128, %s730_s6, [#allocation20]  }
 0x123   : > { %p3738_p0 = scmp.ne.s32.totalorder %s3727_s27, 0 }
 0x124   : > { %p3739_p2 = scmp.ne.s32.totalorder (!%p3738_p0), %s3728_s3, 0 }
 0x125   : > { %759 = sbr.rel (%p3738_p0) target bundleno = 3057 (0xbf1), region = 108 }
 0x12c   : > { %2933 = dma.done.wait (%p3739_p2), [#allocation5], 16  }
 0x12d   : > { %2935 = vsyncadd (%p3739_p2), [#allocation5], 4294967280 }
 0x12e   : > { %2937 = dma.done.wait (%p3739_p2), [#allocation8], 32  }
 0x12f   : > { %2939 = vsyncadd (%p3739_p2), [#allocation8], 4294967264 }
 0x130   : > { %2941 = dma.done.wait (%p3739_p2), [#allocation11], 32  }
 0x131   : > { %2943 = vsyncadd (%p3739_p2), [#allocation11], 4294967264 }
 0x132   : > { %2945 = dma.done.wait (%p3739_p2), [#allocation14], 32  }
 0x133   : > { %2947 = vsyncadd (%p3739_p2), [#allocation14], 4294967264 }
 0x134   : > { %2949 = dma.done.wait (%p3739_p2), [#allocation17], 32  }
 0x135   : > { %2951 = vsyncadd (%p3739_p2), [#allocation17], 4294967264 }
 0x136   : > { %2953 = dma.done.wait (%p3739_p2), [#allocation20], 128  }
 0x137   : > { %2955 = vsyncadd (%p3739_p2), [#allocation20], 4294967168  ;;  %p875_p13 = scmp.lt.s32.totalorder %s2974_s30, 1  ;;  %s3740_s4 = sld [smem:[#allocation39_spill]]  ;;  %vm908_vm0 = vcmask 261120   ;;  %v2994_v15 = vmov 0.0  }
 0x138   : > { %s3741_s22 = sld [smem:[#allocation38_spill]]  ;;  %s3742_s28 = sld [smem:[#allocation44_spill]]  ;;  %2286 = vmatprep.subr.bf16.mxu1 %v2994_v15  ;;  %2314 = vmatprep.subr.bf16.mxu0 %v2994_v15  ;;  %vm2995_vm1 = vmmov 0   ;;  %v2206_v24 = vld [vmem:[#allocation4] ss:$0 sm:$0xff]  ;;  %vm1004_vm2 = vcmask 523520  }
 0x139   : > { %s876_s27 = scalar_select %p875_p13, %s2974_s30, 1  ;;  %2290 = vmatprep.mubr.msk.bf16.mxu1 %vm2995_vm1, %v2994_v15  ;;  %2316 = vmatprep.mubr.msk.bf16.mxu0 %vm2995_vm1, %v2994_v15  ;;  %v2207_v26 = vld [vmem:[#allocation7] ss:$0 sm:$0xff]  ;;  %v2208_v37 = vld [vmem:[#allocation10] ss:$0 sm:$0xff]  ;;  %vm1016_vm3 = vcmask 252928  }
 0x13a   : > { %v2214_v43 = vld [vmem:[#allocation9] ss:$0 sm:$0xff]  ;;  %s2998_s26 = smov 97   ;;  %s2999_s14 = smov 1   ;;  %v1007_v51 = vld [vmem:[%s3678_s20] sm:$0xff]  ;;  %vm1024_vm4 = vcmask 7168  }
 0x13b   : > { %s2204_s24 = sshll.u32 %s876_s27, 3  ;;  %v1006_v54 = vld [vmem:[%s3677_s19] sm:$0xff]  ;;  %vm1165_vm5 = vcmask 64512   ;;  %s3000_s6 = smov 120   ;;  %vm1231_vm7 = vcmask 1043456   ;;  %vm1392_vm8 = vcmask 130112  }
 0x13c   : > { %v1008_v56 = vld [vmem:[#allocation19] sm:$0xff]  ;;  %s3007_s3 = smov 8   ;;  %s3008_s23 = smov 16   ;;  %vm1509_vm9 = vcmask 195712   ;;  %vm1626_vm10 = vcmask 261312  }
 0x13d   : > { %s885_s0 = scalar_lea.vmem %s3740_s4, %s2204_s24  ;;  %s2996_s4 = smov 127   ;;  %v1131_v63 = vld [vmem:[%s3675_s17] sm:$0xff] }
 0x13e   : > { %s881_s1 = scalar_lea.vmem %s3741_s22, %s2204_s24  ;;  %v905_v0 = vld [vmem:[%s885_s0] sm:$0xff]  ;;  %s3743_s7 = smov %s3742_s28 }
 0x13f   : > { %v3428_v1 = vld [vmem:[%s881_s1] sm:$0xff]  ;;  %v909_v2 = vsel %vm908_vm0, %v905_v0, 0.0  ;;  %v2559_v16 = vld [vmem:[%s3743_s7 + $0x8] sm:$0xff]   ;;  %s3744_s24 = sld [smem:[#allocation42_spill]]  ;;  %s2997_s0 = smov 31  }
 0x140   : > { %v1035_v3 = vsel %vm908_vm0, %v3428_v1, 0.0  ;;  %910 = vadd.xlane.f32.xlu0 %v909_v2  ;;  %v2558_v14 = vld [vmem:[%s3742_s28] sm:$0xff]   ;;  %s3005_s22 = smov 96   ;;  %s3006_s1 = smov 72  }
 0x141   : > { %2287 = vmatpush3.bf16.msra.mxu1 %v2558_v14  ;;  %s3009_s27 = smov 24   ;;  %s3749_s2 = sld [smem:[#allocation30_spill]] }
 0x142   : > { %2288 = vmatprep.subr.bf16.mxu1 %v2994_v15  ;;  %s2246_s5 = sshll.u32 %s2974_s30, 7  ;;  %s3010_s28 = smov [#allocation21]  }
 0x144   : > { %1036 = vadd.xlane.f32.xlu0 %v1035_v3  ;;  %v1130_v3 = vld [vmem:[%s3674_s16] sm:$0xff] }
 0x145   : > { %2289 = vmatpush3.bf16.msra.mxu1 %v2559_v16  ;;  %v2560_v31 = vld [vmem:[%s3744_s24] sm:$0xff]   ;;  %v2561_v34 = vld [vmem:[%s3744_s24 + $0x8] sm:$0xff]  }
 0x146   : > { %2294 = vmatprep.subr.bf16.mxu1 %v2994_v15 }
 0x147   : > { %s872_s10 = sand.u32 1, %s3749_s2   ;;  %s2884_s2 = sshll.u32 %s3010_s28, 4  ;;  %s2885_s2 = int_to_ptr.vmem [resolvable:$false] %s2884_s2 }
 0x148   : > { %s2203_s29 = sshll.u32 %s872_s10, 3  ;;  %s1935_s30 = scalar_lea.sflag [#allocation6], %s872_s10 }
 0x1cd   : > { %v911_v4 = vpop.xlane.xlu0 %910 }
 0x1ce   : > { %v913_v5 = vmul.f32 0.03125, %v911_v4 }
 0x1d0   : > { %v914_v6 = vsub.f32 %v905_v0, %v913_v5 }
 0x1d1   : > { %v1037_v7 = vpop.xlane.xlu0 %1036 }
 0x1d2   : > { %v1039_v8 = vmul.f32 0.03125, %v1037_v7  ;;  %v915_v9 = vmul.f32 %v914_v6, %v914_v6 }
 0x1d4   : > { %v1040_v10 = vsub.f32 %v3428_v1, %v1039_v8  ;;  %v916_v11 = vsel %vm908_vm0, %v915_v9, 0.0 }
 0x1d5   : > { %917 = vadd.xlane.f32.xlu1 %v916_v11 }
 0x1d6   : > { %v1041_v12 = vmul.f32 %v1040_v10, %v1040_v10 }
 0x1d8   : > { %v1042_v13 = vsel %vm908_vm0, %v1041_v12, 0.0 }
 0x1d9   : > { %1043 = vadd.xlane.f32.xlu1 %v1042_v13 }
 0x262   : > { %v918_v17 = vpop.xlane.xlu1 %917 }
 0x263   : > { %v919_v18 = vmul.f32 0.03125, %v918_v17 }
 0x265   : > { %v920_v19 = vadd.f32 1e-05, %v919_v18 }
 0x266   : > { %v1044_v20 = vpop.xlane.xlu1 %1043 }
 0x267   : > { %2574 = vrsqrt.f32 %v920_v19  ;;  %v1045_v21 = vmul.f32 0.03125, %v1044_v20 }
 0x269   : > { %v1046_v22 = vadd.f32 1e-05, %v1045_v21 }
 0x26b   : > { %2576 = vrsqrt.f32 %v1046_v22 }
 0x271   : > { %v2575_v23 = vpop.eup %2574 }
 0x272   : > { %v922_v25 = vmul.f32 %v2575_v23, %v914_v6  ;;  %v1132_v6 = vld [vmem:[%s3676_s18] sm:$0xff] }
 0x274   : > { %v929_v27 = vmul.f32 %v2206_v24, %v922_v25 }
 0x275   : > { %v2577_v28 = vpop.eup %2576 }
 0x276   : > { %v1048_v29 = vmul.f32 %v2577_v28, %v1040_v10  ;;  %v936_v30 = vadd.f32 %v2207_v26, %v929_v27  ;;  %v1156_v28 = vlaneseq }
 0x278   : > { %v937_v32 = vpack.c.bf16 %v936_v30, %v936_v30  ;;  %v1055_v33 = vmul.f32 %v2206_v24, %v1048_v29  ;;  %v1157_v29 = vshrl.u32 %v1156_v28, 7  ;;  %v1161_v30 = vand.u32 127, %v1156_v28 }
 0x27a   : > { %2291 = vmatmul.mubr.msk.bf16.vlgmr.msra.gmra.mrb[0].mxu1 %vm908_vm0, %v937_v32  ;;  %v1062_v35 = vadd.f32 %v2207_v26, %v1055_v33  ;;  %vm1162_vm6 = vcmp.ge.s32.totalorder %v1157_v29, %v1161_v30 }
 0x27b   : > { %2295 = vmatpush3.bf16.msra.mxu1 %v2560_v31  ;;  %2298 = vmatprep.mubr.msk.bf16.mxu1 %vm2995_vm1, %v2994_v15 }
 0x27c   : > { %2296 = vmatprep.subr.bf16.mxu1 %v2994_v15  ;;  %v1063_v36 = vpack.c.bf16 %v1062_v35, %v1062_v35 }
 0x27f   : > { %2297 = vmatpush3.bf16.msra.mxu1 %v2561_v34 }
 0x280   : > { %2302 = vmatprep.subr.bf16.mxu1 %v2994_v15 }
 0x282   : > { %2299 = vmatmul.mubr.msk.bf16.vlgmr.msra.gmra.mrb[4].mxu1 %vm908_vm0, %v1063_v36 }
 0x283   : > { %2304 = vmatprep.mubr.msk.bf16.mxu1 %vm2995_vm1, %v2994_v15 }
 0x34d   : > { %v998_v38 = vpop.f32.mrb[0].mxu1 }
 0x34e   : > { %v999_v39 = vadd.f32 %v2208_v37, %v998_v38  ;;  %v2292_v40 = vpop.f32.mrb[1].mxu1 }
 0x34f   : > { %v1001_v41 = vpop.f32.mrb[2].mxu1 }
 0x350   : > { %v2293_v42 = vpop.f32.mrb[3].mxu1  ;;  %1010 = vrot.lane.b32.xlu0 %v999_v39, %s2996_s4  ;;  %1013 = vrot.lane.b32.xlu1 %v999_v39, %s2997_s0  ;;  %1005 = vst.msk [vmem:[#allocation2] sm:$0xff] %vm1004_vm2, %v999_v39  ;;  %v1026_v57 = vmul.f32 %v1006_v54, %v999_v39 }
 0x354   : > { %1018 = vrot.lane.b32.xlu1 %v999_v39, %s2998_s26 }
 0x355   : > { %v1124_v44 = vpop.f32.mrb[4].mxu1 }
 0x356   : > { %v1125_v45 = vadd.f32 %v2214_v43, %v1124_v44  ;;  %v2300_v46 = vpop.f32.mrb[5].mxu1 }
 0x357   : > { %v1127_v47 = vpop.f32.mrb[6].mxu1 }
 0x358   : > { %1021 = vrot.lane.b32.xlu1 %v999_v39, %s2999_s14  ;;  %1134 = vrot.lane.b32.xlu0 %v1125_v45, %s2996_s4  ;;  %v2301_v48 = vpop.f32.mrb[7].mxu1  ;;  %v1150_v7 = vmul.f32 %v1130_v3, %v1125_v45  ;;  %s3001_s4 = smov 112  }
 0x35c   : > { %1137 = vrot.lane.b32.xlu1 %v1125_v45, %s2997_s0  ;;  %1142 = vrot.lane.b32.xlu0 %v1125_v45, %s2998_s26  ;;  %s3002_s0 = smov 104   ;;  %s3003_s26 = smov 88  }
 0x360   : > { %1145 = vrot.lane.b32.xlu1 %v1125_v45, %s2999_s14  ;;  %s3004_s14 = smov 80  }
 0x3c2   : > { %v1014_v49 = vpop.permute.xlu1 %1013  ;;  %v1011_v50 = vpop.permute.xlu0 %1010 }
 0x3c3   : > { %v1017_v52 = vsel %vm1016_vm3, %v1011_v50, %v1014_v49 }
 0x3c4   : > { %v1027_v55 = vmul.f32 %v1017_v52, %v1007_v51 }
 0x3c6   : > { %v1019_v53 = vpop.permute.xlu1 %1018  ;;  %v1028_v60 = vadd.f32 %v1027_v55, %v1026_v57 }
 0x3ca   : > { %v1022_v58 = vpop.permute.xlu1 %1021  ;;  %v1135_v62 = vpop.permute.xlu0 %1134 }
 0x3cb   : > { %v1025_v59 = vsel %vm1024_vm4, %v1019_v53, %v1022_v58 }
 0x3cc   : > { %v1029_v61 = vmul.f32 %v1025_v59, %v1008_v56 }
 0x3ce   : > { %v1030_v0 = vadd.f32 %v1029_v61, %v1028_v60  ;;  %v1138_v2 = vpop.permute.xlu1 %1137  ;;  %v1143_v8 = vpop.permute.xlu0 %1142 }
 0x3cf   : > { %v1141_v4 = vsel %vm1016_vm3, %v1135_v62, %v1138_v2 }
 0x3d0   : > { %1031 = vst.msk [vmem:[#allocation2] sm:$0xff] %vm908_vm0, %v1030_v0  ;;  %v1151_v5 = vmul.f32 %v1141_v4, %v1131_v63 }
 0x3d2   : > { %v1146_v9 = vpop.permute.xlu1 %1145  ;;  %v1152_v11 = vadd.f32 %v1151_v5, %v1150_v7 }
 0x3d3   : > { %v1149_v10 = vsel %vm1024_vm4, %v1143_v8, %v1146_v9 }
 0x3d4   : > { %v1153_v12 = vmul.f32 %v1149_v10, %v1132_v6 }
 0x3d6   : > { %v1154_v13 = vadd.f32 %v1153_v12, %v1152_v11 }
 0x3d7   : > { %v1155_v14 = vld [vmem:[#allocation2] sm:$0xff] }
 0x3d8   : > { %v1163_v16 = vpack.c.bf16 %v1154_v13, %v1154_v13  ;;  %v3484_v17 = vpack.c.bf16 %v1155_v14, %v1155_v14 }
 0x3da   : > { %1279 = vrot.lane.b32.xlu0 %v3484_v17, %s3000_s6  ;;  %1277 = vrot.lane.b32.xlu1 %v1163_v16, %s3000_s6  ;;  %v1170_v18 = vsel %vm1165_vm5, %v3484_v17, 0  ;;  %s874_s6 = scalar_lea.vmem [#allocation21], %s2203_s29  ;;  %s2886_s29 = scalar_lea.vmem %s2885_s2, 256 }
 0x3db   : > { %2303 = vmatpush3.bf16.xpose.msra.mxu1 %v1170_v18 }
 0x3dc   : > { %2308 = vmatprep.subr.bf16.mxu1 %v2994_v15 }
 0x3de   : > { %1396 = vrot.lane.b32.xlu0 %v3484_v17, %s3001_s4  ;;  %1394 = vrot.lane.b32.xlu1 %v1163_v16, %s3001_s4  ;;  %s3745_s4 = sld [smem:[#allocation47_spill]] }
 0x3e2   : > { %1513 = vrot.lane.b32.xlu0 %v3484_v17, %s3002_s0  ;;  %1511 = vrot.lane.b32.xlu1 %v1163_v16, %s3002_s0 }
 0x3e3   : > { %2305 = vmatmul.mubr.msk.bf16.vlgmr.msra.gmra.mrb[8].mxu1 %vm1165_vm5, %v1163_v16 }
 0x3e4   : > { %2310 = vmatprep.mubr.msk.bf16.mxu1 %vm2995_vm1, %v2994_v15 }
 0x44c   : > { %v1280_v19 = vpop.permute.xlu0 %1279  ;;  %v1278_v22 = vpop.permute.xlu1 %1277 }
 0x44d   : > { %v1285_v20 = vsel %vm1165_vm5, %v1280_v19, 0 }
 0x44e   : > { %2315 = vmatpush3.bf16.xpose.msra.mxu0 %v1285_v20 }
 0x44f   : > { %2326 = vmatprep.subr.bf16.mxu0 %v2994_v15 }
 0x450   : > { %v1397_v21 = vpop.permute.xlu0 %1396  ;;  %v1395_v25 = vpop.permute.xlu1 %1394 }
 0x451   : > { %v1402_v23 = vsel %vm1165_vm5, %v1397_v21, 0 }
 0x454   : > { %v1514_v24 = vpop.permute.xlu0 %1513  ;;  %v1512_v27 = vpop.permute.xlu1 %1511 }
 0x455   : > { %2317 = vmatmul.mubr.msk.bf16.vlgmr.msra.gmra.mrb[0].mxu0 %vm1165_vm5, %v1278_v22  ;;  %v1519_v26 = vsel %vm1165_vm5, %v1514_v24, 0 }
 0x456   : > { %2327 = vmatpush3.bf16.xpose.msra.mxu0 %v1402_v23  ;;  %2328 = vmatprep.mubr.msk.bf16.mxu0 %vm2995_vm1, %v2994_v15 }
 0x457   : > { %2338 = vmatprep.subr.bf16.mxu0 %v2994_v15 }
 0x45d   : > { %2329 = vmatmul.mubr.msk.bf16.vlgmr.msra.gmra.mrb[4].mxu0 %vm1165_vm5, %v1395_v25 }
 0x45e   : > { %2339 = vmatpush3.bf16.xpose.msra.mxu0 %v1519_v26  ;;  %2340 = vmatprep.mubr.msk.bf16.mxu0 %vm2995_vm1, %v2994_v15 }
 0x45f   : > { %2350 = vmatprep.subr.bf16.mxu0 %v2994_v15 }
 0x465   : > { %2341 = vmatmul.mubr.msk.bf16.vlgmr.msra.gmra.mrb[8].mxu0 %vm1165_vm5, %v1512_v27 }
 0x466   : > { %2354 = vmatprep.mubr.msk.bf16.mxu0 %vm2995_vm1, %v2994_v15 }
 0x4b6   : > { %v1206_v31 = vpop.f32.mrb[8].mxu1 }
 0x4b7   : > { %v1212_v32 = vsel %vm1162_vm6, %v1206_v31, -1e+30  ;;  %v2306_v33 = vpop.f32.mrb[9].mxu1 }
 0x4b8   : > { %v1209_v34 = vpop.f32.mrb[10].mxu1  ;;  %v1213_v35 = vsel %vm1165_vm5, %v1212_v32, -inf }
 0x4b9   : > { %1214 = vmax.xlane.f32.xlu0 %v1213_v35  ;;  %v2307_v36 = vpop.f32.mrb[11].mxu1 }
 0x528   : > { %v1321_v37 = vpop.f32.mrb[0].mxu0 }
 0x529   : > { %v1327_v38 = vsel %vm1162_vm6, %v1321_v37, -1e+30  ;;  %v2318_v39 = vpop.f32.mrb[1].mxu0 }
 0x52a   : > { %v1324_v40 = vpop.f32.mrb[2].mxu0  ;;  %v1328_v41 = vsel %vm1165_vm5, %v1327_v38, -inf }
 0x52b   : > { %1329 = vmax.xlane.f32.xlu1 %v1328_v41  ;;  %v2319_v42 = vpop.f32.mrb[3].mxu0 }
 0x530   : > { %v1438_v43 = vpop.f32.mrb[4].mxu0 }
 0x531   : > { %v1444_v44 = vsel %vm1162_vm6, %v1438_v43, -1e+30  ;;  %v2330_v45 = vpop.f32.mrb[5].mxu0 }
 0x532   : > { %v1441_v46 = vpop.f32.mrb[6].mxu0  ;;  %v1445_v47 = vsel %vm1165_vm5, %v1444_v44, -inf }
 0x533   : > { %1446 = vmax.xlane.f32.xlu0 %v1445_v47  ;;  %v2331_v48 = vpop.f32.mrb[7].mxu0 }
 0x538   : > { %v1555_v49 = vpop.f32.mrb[8].mxu0 }
 0x539   : > { %v1561_v50 = vsel %vm1162_vm6, %v1555_v49, -1e+30  ;;  %v2342_v51 = vpop.f32.mrb[9].mxu0  ;;  %v2562_v49 = vld [vmem:[%s3666_s8] sm:$0xff]  }
 0x53a   : > { %v1558_v52 = vpop.f32.mrb[10].mxu0  ;;  %v1562_v53 = vsel %vm1165_vm5, %v1561_v50, -inf  ;;  %2351 = vmatpush3.bf16.msra.mxu0 %v2562_v49 }
 0x53b   : > { %1563 = vmax.xlane.f32.xlu0 %v1562_v53  ;;  %v2343_v54 = vpop.f32.mrb[11].mxu0  ;;  %2352 = vmatprep.subr.bf16.mxu0 %v2994_v15 }
 0x546   : > { %v1215_v55 = vpop.xlane.xlu0 %1214 }
 0x547   : > { %v1216_v56 = vsub.f32 %v1212_v32, %v1215_v55 }
 0x549   : > { %v1217_v57 = vmul.f32 1.442695, %v1216_v56 }
 0x54b   : > { %2578 = vpow2.f32 %v1217_v57 }
 0x555   : > { %v2579_v58 = vpop.eup %2578 }
 0x556   : > { %v1219_v59 = vsel %vm1165_vm5, %v2579_v58, 0.0 }
 0x557   : > { %1220 = vadd.xlane.f32.xlu0 %v1219_v59 }
 0x5b8   : > { %v1330_v60 = vpop.xlane.xlu1 %1329 }
 0x5b9   : > { %v1331_v61 = vsub.f32 %v1327_v38, %v1330_v60  ;;  %v2226_v60 = vld [vmem:[#allocation12] ss:$0 sm:$0xff] }
 0x5bb   : > { %v1332_v62 = vmul.f32 1.442695, %v1331_v61 }
 0x5bd   : > { %2580 = vpow2.f32 %v1332_v62 }
 0x5c0   : > { %v1447_v63 = vpop.xlane.xlu0 %1446 }
 0x5c1   : > { %v1448_v0 = vsub.f32 %v1444_v44, %v1447_v63 }
 0x5c3   : > { %v1449_v2 = vmul.f32 1.442695, %v1448_v0 }
 0x5c5   : > { %2582 = vpow2.f32 %v1449_v2 }
 0x5c7   : > { %v2581_v3 = vpop.eup %2580 }
 0x5c8   : > { %v1334_v4 = vsel %vm1165_vm5, %v2581_v3, 0.0  ;;  %v1564_v7 = vpop.xlane.xlu0 %1563 }
 0x5c9   : > { %1335 = vadd.xlane.f32.xlu1 %v1334_v4  ;;  %v1565_v8 = vsub.f32 %v1561_v50, %v1564_v7  ;;  %v2563_v50 = vld [vmem:[%s3666_s8 + $0x8] sm:$0xff]  }
 0x5ca   : > { %2353 = vmatpush3.bf16.msra.mxu0 %v2563_v50 }
 0x5cb   : > { %v1566_v9 = vmul.f32 1.442695, %v1565_v8  ;;  %2366 = vmatprep.subr.bf16.mxu0 %v2994_v15 }
 0x5cd   : > { %2584 = vpow2.f32 %v1566_v9 }
 0x5cf   : > { %v2583_v5 = vpop.eup %2582 }
 0x5d0   : > { %v1451_v6 = vsel %vm1165_vm5, %v2583_v5, 0.0 }
 0x5d1   : > { %1452 = vadd.xlane.f32.xlu0 %v1451_v6 }
 0x5d7   : > { %v2585_v10 = vpop.eup %2584 }
 0x5d8   : > { %v1568_v11 = vsel %vm1165_vm5, %v2585_v10, 0.0 }
 0x5da   : > { %1340 = vrot.lane.b32.xlu1 %v3484_v17, %s3003_s26  ;;  %s3746_s26 = smov %s3745_s4 }
 0x5de   : > { %1457 = vrot.lane.b32.xlu1 %v3484_v17, %s3004_s14 }
 0x5e4   : > { %v1221_v12 = vpop.xlane.xlu0 %1220 }
 0x5e5   : > { %2586 = vrcp.f32 %v1221_v12 }
 0x5e7   : > { %1226 = vrot.lane.b32.xlu0 %v3484_v17, %s3005_s22  ;;  %s3751_s22 = sld [smem:[#allocation49_spill]] }
 0x5ef   : > { %v2587_v14 = vpop.eup %2586 }
 0x5f0   : > { %v1223_v18 = vmul.f32 %v2587_v14, %v2579_v58 }
 0x5f2   : > { %v1224_v22 = vpack.c.bf16 %v1223_v18, %v1223_v18 }
 0x602   : > { %1569 = vadd.xlane.f32.xlu1 %v1568_v11 }
 0x613   : > { %1574 = vrot.lane.b32.xlu1 %v3484_v17, %s3006_s1  ;;  %s3610_s1 = scalar_lea.hbm %s3751_s22, %s2246_s5 }
 0x656   : > { %v1336_v13 = vpop.xlane.xlu1 %1335 }
 0x657   : > { %2588 = vrcp.f32 %v1336_v13 }
 0x65a   : > { %v1341_v21 = vpop.permute.xlu1 %1340 }
 0x65b   : > { %v1346_v17 = vsel %vm1231_vm7, %v1341_v21, 0 }
 0x65e   : > { %v1453_v16 = vpop.xlane.xlu0 %1452  ;;  %v1458_v25 = vpop.permute.xlu1 %1457 }
 0x65f   : > { %2590 = vrcp.f32 %v1453_v16  ;;  %v1463_v28 = vsel %vm1231_vm7, %v1458_v25, 0  ;;  %v2230_v16 = vld [vmem:[#allocation13] ss:$0 sm:$0xff] }
 0x661   : > { %v2589_v23 = vpop.eup %2588 }
 0x662   : > { %v1227_v19 = vpop.permute.xlu0 %1226  ;;  %v1338_v24 = vmul.f32 %v2589_v23, %v2581_v3 }
 0x663   : > { %v1233_v20 = vsel %vm1231_vm7, %v1227_v19, 0  ;;  %v2231_v19 = vld [vmem:[#allocation15] ss:$0 sm:$0xff] }
 0x664   : > { %2309 = vmatpush3.bf16.msra.mxu1 %v1233_v20  ;;  %v1339_v26 = vpack.c.bf16 %v1338_v24, %v1338_v24 }
 0x665   : > { %2320 = vmatprep.subr.bf16.mxu1 %v2994_v15 }
 0x667   : > { %2311 = vmatmul.mubr.msk.bf16.vlgmr.msra.gmra.mrb[12].mxu1 %vm1165_vm5, %v1224_v22 }
 0x668   : > { %2321 = vmatpush3.bf16.msra.mxu1 %v1346_v17  ;;  %2322 = vmatprep.mubr.msk.bf16.mxu1 %vm2995_vm1, %v2994_v15 }
 0x669   : > { %2332 = vmatprep.subr.bf16.mxu1 %v2994_v15  ;;  %v2591_v27 = vpop.eup %2590 }
 0x66a   : > { %v1455_v29 = vmul.f32 %v2591_v27, %v2583_v5 }
 0x66c   : > { %v1456_v30 = vpack.c.bf16 %v1455_v29, %v1455_v29 }
 0x66f   : > { %2323 = vmatmul.mubr.msk.bf16.vlgmr.msra.gmra.mrb[16].mxu1 %vm1165_vm5, %v1339_v26 }
 0x670   : > { %2333 = vmatpush3.bf16.msra.mxu1 %v1463_v28  ;;  %2334 = vmatprep.mubr.msk.bf16.mxu1 %vm2995_vm1, %v2994_v15 }
 0x671   : > { %2344 = vmatprep.subr.bf16.mxu1 %v2994_v15 }
 0x677   : > { %2335 = vmatmul.mubr.msk.bf16.vlgmr.msra.gmra.mrb[20].mxu1 %vm1165_vm5, %v1456_v30  ;;  %v2232_v30 = vld [vmem:[#allocation16] ss:$0 sm:$0xff] }
 0x678   : > { %2346 = vmatprep.mubr.msk.bf16.mxu1 %vm2995_vm1, %v2994_v15 }
 0x68f   : > { %v1570_v31 = vpop.xlane.xlu1 %1569 }
 0x690   : > { %2592 = vrcp.f32 %v1570_v31 }
 0x693   : > { %v1575_v32 = vpop.permute.xlu1 %1574 }
 0x694   : > { %v1580_v33 = vsel %vm1231_vm7, %v1575_v32, 0 }
 0x695   : > { %2345 = vmatpush3.bf16.msra.mxu1 %v1580_v33 }
 0x696   : > { %2358 = vmatprep.subr.bf16.mxu1 %v2994_v15 }
 0x69a   : > { %v2593_v34 = vpop.eup %2592 }
 0x69b   : > { %v1572_v35 = vmul.f32 %v2593_v34, %v2585_v10  ;;  %v2564_v10 = vld [vmem:[%s3745_s4] sm:$0xff]   ;;  %s1949_s4 = sshll.u32 %s874_s6, 4  ;;  %s3612_s4 = int_to_ptr.vmem [resolvable:$true] %s1949_s4 }
 0x69c   : > { %p2887_p11 = scmp.lt.s32.totalorder %s3612_s4, %s2885_s2 }
 0x69d   : > { %v1573_v36 = vpack.c.bf16 %v1572_v35, %v1572_v35 }
 0x69f   : > { %2347 = vmatmul.mubr.msk.bf16.vlgmr.msra.gmra.mrb[24].mxu1 %vm1165_vm5, %v1573_v36 }
 0x6a0   : > { %2362 = vmatprep.mubr.msk.bf16.mxu1 %vm2995_vm1, %v2994_v15  ;;  %2359 = vmatpush3.bf16.msra.mxu1 %v2564_v10 }
 0x6a1   : > { %2360 = vmatprep.subr.bf16.mxu1 %v2994_v15 }
 0x73a   : > { %v1269_v37 = vpop.f32.mrb[12].mxu1 }
 0x73b   : > { %1275 = vst.msk [vmem:[#allocation3] sm:$0xff] %vm1165_vm5, %v1269_v37  ;;  %v2312_v38 = vpop.f32.mrb[13].mxu1 }
 0x73c   : > { %v1272_v39 = vpop.f32.mrb[14].mxu1 }
 0x73d   : > { %v2313_v40 = vpop.f32.mrb[15].mxu1 }
 0x742   : > { %v1382_v41 = vpop.f32.mrb[16].mxu1 }
 0x743   : > { %1389 = vrot.lane.b32.xlu0 %v1382_v41, %s3007_s3  ;;  %v2324_v42 = vpop.f32.mrb[17].mxu1  ;;  %s3747_s3 = sld [smem:[#allocation48_spill]] }
 0x744   : > { %v1385_v43 = vpop.f32.mrb[18].mxu1 }
 0x745   : > { %v2325_v44 = vpop.f32.mrb[19].mxu1 }
 0x749   : > { %v2566_v23 = vld [vmem:[%s3747_s3] sm:$0xff]  }
 0x74a   : > { %v1499_v45 = vpop.f32.mrb[20].mxu1 }
 0x74b   : > { %1506 = vrot.lane.b32.xlu1 %v1499_v45, %s3008_s23  ;;  %v2336_v46 = vpop.f32.mrb[21].mxu1  ;;  %s3748_s23 = smov %s3747_s3  ;;  %s2880_s3 = scalar_lea.vmem %s3612_s4, 128 }
 0x74c   : > { %v1502_v47 = vpop.f32.mrb[22].mxu1  ;;  %v2567_v17 = vld [vmem:[%s3748_s23 + $0x8] sm:$0xff]   ;;  %v2568_v24 = vld [vmem:[%s3748_s23 + $0x10] sm:$0xff]   ;;  %v2569_v25 = vld [vmem:[%s3748_s23 + $0x18] sm:$0xff]   ;;  %p2881_p1 = scmp.ne.s32.totalorder %s3612_s4, %s2880_s3  ;;  %p2888_p3 = scmp.lt.s32.totalorder %s2886_s29, %s2880_s3 }
 0x74d   : > { %v2337_v48 = vpop.f32.mrb[23].mxu1  ;;  %v2570_v26 = vld [vmem:[%s3748_s23 + $0x20] sm:$0xff]   ;;  %v2571_v27 = vld [vmem:[%s3748_s23 + $0x28] sm:$0xff]   ;;  %v2572_v28 = vld [vmem:[%s3748_s23 + $0x30] sm:$0xff]  }
 0x74e   : > { %v2573_v29 = vld [vmem:[%s3748_s23 + $0x38] sm:$0xff]   ;;  %p2889_p5 = por %p2888_p3, %p2887_p11 }
 0x772   : > { %v1616_v51 = vpop.f32.mrb[24].mxu1 }
 0x773   : > { %1623 = vrot.lane.b32.xlu0 %v1616_v51, %s3009_s27  ;;  %v2348_v52 = vpop.f32.mrb[25].mxu1  ;;  %s3750_s27 = sld [smem:[#allocation35_spill]] }
 0x774   : > { %v1619_v53 = vpop.f32.mrb[26].mxu1 }
 0x775   : > { %v2349_v54 = vpop.f32.mrb[27].mxu1 }
 0x779   : > { %p3752_p4 = scmp.ne.s32.totalorder %s3750_s27, 0 }
 0x77b   : > { %p2882_p8 = pnand %p2881_p1, %p3752_p4 }
 0x77d   : > { %p2883_p10 = pneg %p2882_p8 }
 0x77f   : > { %p2890_p6 = pnand %p2889_p5, %p2883_p10 }
 0x7b5   : > { %v1390_v55 = vpop.permute.xlu0 %1389 }
 0x7b6   : > { %1393 = vst.msk [vmem:[#allocation3] sm:$0xff] %vm1392_vm8, %v1390_v55 }
 0x7bd   : > { %v1507_v56 = vpop.permute.xlu1 %1506 }
 0x7be   : > { %1510 = vst.msk [vmem:[#allocation3] sm:$0xff] %vm1509_vm9, %v1507_v56 }
 0x7e5   : > { %v1624_v57 = vpop.permute.xlu0 %1623 }
 0x7e6   : > { %1627 = vst.msk [vmem:[#allocation3] sm:$0xff] %vm1626_vm10, %v1624_v57 }
 0x7ed   : > { %v1628_v58 = vld [vmem:[#allocation3] sm:$0xff] }
 0x7ee   : > { %v1629_v59 = vpack.c.bf16 %v1628_v58, %v1628_v58 }
 0x7f0   : > { %2355 = vmatmul.mubr.msk.bf16.vlgmr.msra.gmra.mrb[12].mxu0 %vm908_vm0, %v1629_v59 }
 0x7f1   : > { %2382 = vmatprep.mubr.msk.bf16.mxu0 %vm2995_vm1, %v2994_v15  ;;  %2367 = vmatpush3.bf16.msra.mxu0 %v2566_v23 }
 0x7f2   : > { %2368 = vmatprep.subr.bf16.mxu0 %v2994_v15 }
 0x7f5   : > { %2369 = vmatpush3.bf16.msra.mxu0 %v2567_v17 }
 0x7f6   : > { %2370 = vmatprep.subr.bf16.mxu0 %v2994_v15 }
 0x7f9   : > { %2371 = vmatpush3.bf16.msra.mxu0 %v2568_v24 }
 0x7fa   : > { %2372 = vmatprep.subr.bf16.mxu0 %v2994_v15 }
 0x7fd   : > { %2373 = vmatpush3.bf16.msra.mxu0 %v2569_v25 }
 0x7fe   : > { %2374 = vmatprep.subr.bf16.mxu0 %v2994_v15 }
 0x801   : > { %2375 = vmatpush3.bf16.msra.mxu0 %v2570_v26 }
 0x802   : > { %2376 = vmatprep.subr.bf16.mxu0 %v2994_v15 }
 0x805   : > { %2377 = vmatpush3.bf16.msra.mxu0 %v2571_v27 }
 0x806   : > { %2378 = vmatprep.subr.bf16.mxu0 %v2994_v15 }
 0x809   : > { %2379 = vmatpush3.bf16.msra.mxu0 %v2572_v28 }
 0x80a   : > { %2380 = vmatprep.subr.bf16.mxu0 %v2994_v15 }
 0x80d   : > { %2381 = vmatpush3.bf16.msra.mxu0 %v2573_v29 }
 0x8c3   : > { %v1690_v61 = vpop.f32.mrb[12].mxu0 }
 0x8c4   : > { %v1691_v62 = vadd.f32 %v2226_v60, %v1690_v61  ;;  %v2356_v63 = vpop.f32.mrb[13].mxu0  ;;  %v2236_v61 = vld [vmem:[#allocation18] ss:$0 sm:$0xff] }
 0x8c5   : > { %v1693_v0 = vpop.f32.mrb[14].mxu0 }
 0x8c6   : > { %v3559_v2 = vadd.f32 %v1691_v62, %v3428_v1  ;;  %v2357_v3 = vpop.f32.mrb[15].mxu0  ;;  %v2565_v1 = vld [vmem:[%s3746_s26 + $0x8] sm:$0xff]  }
 0x8c7   : > { %2361 = vmatpush3.bf16.msra.mxu1 %v2565_v1 }
 0x8c8   : > { %v1699_v4 = vsel %vm908_vm0, %v3559_v2, 0.0 }
 0x8c9   : > { %1700 = vadd.xlane.f32.xlu1 %v1699_v4 }
 0x956   : > { %v1701_v5 = vpop.xlane.xlu1 %1700 }
 0x957   : > { %v1702_v6 = vmul.f32 0.03125, %v1701_v5 }
 0x959   : > { %v1703_v7 = vsub.f32 %v3559_v2, %v1702_v6 }
 0x95b   : > { %v1704_v8 = vmul.f32 %v1703_v7, %v1703_v7 }
 0x95d   : > { %v1705_v9 = vsel %vm908_vm0, %v1704_v8, 0.0 }
 0x95e   : > { %1706 = vadd.xlane.f32.xlu0 %v1705_v9 }
 0x9eb   : > { %v1707_v11 = vpop.xlane.xlu0 %1706 }
 0x9ec   : > { %v1708_v12 = vmul.f32 0.03125, %v1707_v11 }
 0x9ee   : > { %v1709_v13 = vadd.f32 1e-05, %v1708_v12 }
 0x9f0   : > { %2594 = vrsqrt.f32 %v1709_v13 }
 0x9fa   : > { %v2595_v14 = vpop.eup %2594 }
 0x9fb   : > { %v1711_v18 = vmul.f32 %v2595_v14, %v1703_v7 }
 0x9fd   : > { %v1718_v20 = vmul.f32 %v2230_v16, %v1711_v18 }
 0x9ff   : > { %v1725_v21 = vadd.f32 %v2231_v19, %v1718_v20 }
 0xa01   : > { %v1726_v22 = vpack.c.bf16 %v1725_v21, %v1725_v21 }
 0xa03   : > { %2363 = vmatmul.mubr.msk.bf16.vlgmr.msra.gmra.mrb[28].mxu1 %vm908_vm0, %v1726_v22 }
 0xad6   : > { %v1787_v31 = vpop.f32.mrb[28].mxu1 }
 0xad7   : > { %v1788_v32 = vadd.f32 %v2232_v30, %v1787_v31  ;;  %v2364_v33 = vpop.f32.mrb[29].mxu1 }
 0xad8   : > { %v1790_v34 = vpop.f32.mrb[30].mxu1 }
 0xad9   : > { %v1794_v35 = vmul.f32 0.70710677, %v1788_v32  ;;  %v2365_v36 = vpop.f32.mrb[31].mxu1  ;;  %v1793_v57 = vmul.f32 0.5, %v1788_v32 }
 0xadb   : > { %v1795_v37 = vand.u32 2147483647, %v1794_v35  ;;  %vm1815_vm11 = vcmp.ge.f32.partialorder %v1794_v35, 0.0 }
 0xadd   : > { %v1796_v38 = vmul.f32 0.3275911, %v1795_v37  ;;  %v1809_v40 = vsub.f32 0.0, %v1795_v37 }
 0xadf   : > { %v1797_v39 = vadd.f32 1.0, %v1796_v38  ;;  %v1810_v42 = vmul.f32 %v1809_v40, %v1795_v37 }
 0xae1   : > { %2596 = vrcp.f32 %v1797_v39  ;;  %v1811_v44 = vmul.f32 1.442695, %v1810_v42 }
 0xae3   : > { %2598 = vpow2.f32 %v1811_v44 }
 0xaeb   : > { %v2597_v41 = vpop.eup %2596 }
 0xaec   : > { %v1800_v15 = vmul.f32 1.0614054, %v2597_v41 }
 0xaed   : > { %v2599_v52 = vpop.eup %2598 }
 0xaee   : > { %v1801_v43 = vadd.f32 -1.4531521, %v1800_v15 }
 0xaf0   : > { %v1802_v45 = vmul.f32 %v2597_v41, %v1801_v43 }
 0xaf2   : > { %v1803_v46 = vadd.f32 1.4214138, %v1802_v45 }
 0xaf4   : > { %v1804_v47 = vmul.f32 %v2597_v41, %v1803_v46 }
 0xaf6   : > { %v1805_v48 = vadd.f32 -0.28449672, %v1804_v47 }
 0xaf8   : > { %v1806_v49 = vmul.f32 %v2597_v41, %v1805_v48 }
 0xafa   : > { %v1807_v50 = vadd.f32 0.2548296, %v1806_v49 }
 0xafc   : > { %v1808_v51 = vmul.f32 %v2597_v41, %v1807_v50 }
 0xafe   : > { %v1813_v53 = vmul.f32 %v2599_v52, %v1808_v51 }
 0xb00   : > { %v1814_v54 = vsub.f32 1.0, %v1813_v53 }
 0xb02   : > { %v1816_v55 = vsub.f32 0.0, %v1814_v54 }
 0xb04   : > { %v1817_v56 = vsel %vm1815_vm11, %v1814_v54, %v1816_v55 }
 0xb05   : > { %v1818_v58 = vadd.f32 1.0, %v1817_v56 }
 0xb07   : > { %v1819_v59 = vmul.f32 %v1818_v58, %v1793_v57 }
 0xb09   : > { %v1820_v60 = vpack.c.bf16 %v1819_v59, %v1819_v59 }
 0xb0b   : > { %2383 = vmatmul.mubr.bf16.vlgmr.msra.gmra.mrb[16].mxu0 %v1820_v60 }
 0xbde   : > { %v1926_v62 = vpop.f32.mrb[16].mxu0 }
 0xbdf   : > { %v1927_v63 = vadd.f32 %v2236_v61, %v1926_v62  ;;  %v2384_v0 = vpop.f32.mrb[17].mxu0 }
 0xbe0   : > { %v1929_v3 = vpop.f32.mrb[18].mxu0 }
 0xbe1   : > { %v1932_v4 = vadd.f32 %v1927_v63, %v3559_v2  ;;  %v2385_v5 = vpop.f32.mrb[19].mxu0 }
 0xbe3   : > { %1933 = vst.msk [vmem:[%s874_s6] sm:$0xff] %vm908_vm0, %v1932_v4 }
 0xbe4   : > { %2893 = shalt.err (!%p2890_p6)
}
 0xbe5   : > { %s2894_s10 = scalar_lea.hbm %s3610_s1, 128  ;;  %s2898_s0 = scalar_lea.hbm %s3751_s22, 256 }
 0xbe6   : > { %p2895_p7 = scmp.ne.s32.totalorder %s3610_s1, %s2894_s10  ;;  %p2899_p0 = scmp.lt.u32.totalorder %s3610_s1, %s3751_s22 }
 0xbe7   : > { %p2900_p2 = scmp.lt.u32.totalorder %s2898_s0, %s2894_s10  ;;  %p2902_p1 = scmp.lt.u32.totalorder %s2894_s10, %s3610_s1 }
 0xbe8   : > { %p2896_p9 = pnand %p2895_p7, %p3752_p4 }
 0xbe9   : > { %p2901_p13 = por %p2900_p2, %p2899_p0 }
 0xbea   : > { %p2897_p12 = pneg %p2896_p9 }
 0xbeb   : > { %p2903_p8 = por %p2902_p1, %p2901_p13 }
 0xbed   : > { %p2904_p10 = pnand %p2903_p8, %p2897_p12 }
 0xbef   : > { %2907 = shalt.err (!%p2904_p10)
}
 0xbf0   : > { %2426 = dma.vmem_to_hbm [thread:$0]  (%p3752_p4), %s3612_s4, 128, %s3610_s1, %s1935_s30  }
 0xbf1 PF: > { %s3753_s3 = sld [smem:[#allocation33_spill]]  ;;  %s3754_s2 = sld [smem:[#allocation29_spill]] }
 0xbf2   : > { %s3755_s29 = sld [smem:[#allocation36_spill]] }
 0xbf7   : > { %p2483_p11 = scmp.ge.s32.totalorder %s3753_s3, 2  ;;  %s1961_s5 = sand.u32 1, %s3754_s2  }
 0xbf8   : > { %p3756_p3 = scmp.ne.s32.totalorder %s3755_s29, 0  ;;  %s1962_s6 = scalar_lea.sflag [#allocation6], %s1961_s5 }
 0xbfa   : > { %p2460_p5 = pnand %p2483_p11, %p3756_p3 }
 0xbfc   : > { %2957 = dma.done.wait (!%p2460_p5), %s1962_s6, 128  }
 0xbfd   : > { %2959 = vsyncadd (!%p2460_p5), %s1962_s6, 4294967168  ;;  %s41_s0 = sadd.s32 1, %s3753_s3   ;;  %s3757_s3 = sld [smem:[#allocation30_spill]] }
 0xbfe   : > { %p38_p6 = scmp.ge.s32.totalorder %s41_s0, 4   ;;  %s3758_s28 = sld [smem:[#allocation31_spill]] }
 0xbff   : > { %s3759_s29 = sld [smem:[#allocation37_spill]]  ;;  %s3760_s30 = sld [smem:[#allocation32_spill]] }
 0xc00   : > { %s3761_s4 = sld [smem:[#allocation34_spill]]  ;;  %40 = sbr.rel (!%p38_p6) target bundleno = 23 (0x17), region = 200 }
 0xc07   :  { %1967 = vsyncpa [#allocation5], 1 }
 0xc08   :  { %1969 = vsyncpa [#allocation5 + $0x1], 1 }
 0xc09   :  { %1970 = vsyncpa [#allocation8], 1 }
 0xc0a   :  { %1971 = vsyncpa [#allocation11], 1 }
 0xc0b   :  { %1972 = vsyncpa [#allocation14], 1 }
 0xc0c   :  { %1973 = vsyncpa [#allocation17], 1 }
 0xc0d   :  { %1974 = vsyncpa [#allocation20], 1 }
 0xc0e   :  { %1975 = vsyncpa [#allocation6], 1 }
 0xc0f   :  { %1977 = vsyncpa [#allocation6 + $0x1], 1 }

</bundles_post_ra>
